<compile_context>
chip_gen: v7x
topology: tpu7x:2x2x1
jax: 0.10.0
libtpu: 0.0.40
codegen_flags: <defaults>
</compile_context>

<pallas_src>
import functools
import math

import jax
import jax.numpy as jnp
from jax.experimental import pallas as pl
from jax.experimental.pallas import tpu as pltpu


# ------------------------------ fused kernel -------------------------------

def fused_forward_kernel(T, E, S, HEADS, A, K2C,
                         patches_ref, infos_ref,
                         conv_ref, qkv_ref, mha_ref,
                         fc1_ref, fc2_ref, fc3_ref,
                         out_ref):
    """Forward for a tile of T examples; batch folded into matmul dims.

    patches: (K2C, T*E)  bf16  im2col in conv-space layout (columns = b*E + e)
    infos:   (T, A)      f32
    out:     (T, 128)    f32   (first OF lanes valid, rest zero)
    """
    f32, bf16 = jnp.float32, jnp.bfloat16
    TE = T * E
    SE = S * E
    Dh = E // HEADS
    inv_sqrt = 1.0 / math.sqrt(Dh)

    # ---------------- unpack the small parameter slabs ----------------
    conv_all = conv_ref[...]
    conv_w = conv_all[:, :K2C]                               # (S, K2C) bf16
    conv_shift = conv_all[:, K2C:K2C + 1].astype(f32)        # (S, 1)
    qkv_all = qkv_ref[...]
    qkv_w = qkv_all[:, :3 * S]                               # (3S, 3S) bf16
    qkv_shift = qkv_all[:, 3 * S:3 * S + 1].astype(f32)      # (3S, 1)
    mha = mha_ref[...]
    wqT, wkT, wvT = mha[0:E], mha[E:2 * E], mha[2 * E:3 * E]  # (E, E) bf16
    bq = mha[3 * E + 0:3 * E + 1].astype(f32)                # (1, E)
    bk = mha[3 * E + 1:3 * E + 2].astype(f32)
    bv = mha[3 * E + 2:3 * E + 3].astype(f32)

    # ---- eqp_conv_block: depthwise ∘ 1x1 ∘ BN2d folded into one matmul ----
    flat = jnp.dot(conv_w, patches_ref[...], preferred_element_type=f32)
    flat = flat + conv_shift                                 # (S, TE)
    flat = jnp.where(flat > 0, flat, 0.01 * flat)            # LeakyReLU(0.01)

    # ---- q/k/v Conv1d(k=3,'same') + BN1d: one merged matmul over the taps ----
    zero_col = jnp.zeros((S, 1), f32)
    sh_m1 = jnp.concatenate([zero_col, flat[:, :TE - 1]], axis=1)   # in[l-1]
    sh_p1 = jnp.concatenate([flat[:, 1:], zero_col], axis=1)        # in[l+1]
    e_idx = jax.lax.broadcasted_iota(jnp.int32, (S, TE), 1) % E
    sh_m1 = jnp.where(e_idx == 0, 0.0, sh_m1)                # no leakage across examples
    sh_p1 = jnp.where(e_idx == E - 1, 0.0, sh_p1)
    qkv_in = jnp.concatenate([sh_m1, flat, sh_p1], axis=0).astype(bf16)   # (3S, TE)
    qkv = jnp.dot(qkv_w, qkv_in, preferred_element_type=f32) + qkv_shift  # (3S, TE)

    # ---- layout transition: conv space -> per-example sublane stacks ----
    q2, k2, v2 = qkv[0:S], qkv[S:2 * S], qkv[2 * S:3 * S]
    qall = jnp.concatenate([q2[:, b * E:(b + 1) * E] for b in range(T)], axis=0)  # (T*S, E)
    kall = jnp.concatenate([k2[:, b * E:(b + 1) * E] for b in range(T)], axis=0)
    vall = jnp.concatenate([v2[:, b * E:(b + 1) * E] for b in range(T)], axis=0)
    flat3 = jnp.stack([flat[:, b * E:(b + 1) * E] for b in range(T)], axis=0)     # (T, S, E)

    # ---- MultiheadAttention: in-projection batched over the whole tile ----
    Qp = jnp.dot(qall.astype(bf16), wqT, preferred_element_type=f32) + bq   # (T*S, E)
    Kp = jnp.dot(kall.astype(bf16), wkT, preferred_element_type=f32) + bk
    Vp = jnp.dot(vall.astype(bf16), wvT, preferred_element_type=f32) + bv
    Qp3 = jnp.stack([Qp[b * S:(b + 1) * S] for b in range(T)], axis=0)      # (T, S, E)
    Kp3 = jnp.stack([Kp[b * S:(b + 1) * S] for b in range(T)], axis=0)
    Vp3 = jnp.stack([Vp[b * S:(b + 1) * S] for b in range(T)], axis=0)

    # scores for all (head, example) pairs, softmax batched in one pass
    scores = []
    for h in range(HEADS):
        lo = h * Dh
        Qh = (Qp3[:, :, lo:lo + Dh] * inv_sqrt).astype(bf16)
        Kh = Kp3[:, :, lo:lo + Dh].astype(bf16)
        scores.append(jnp.einsum("tqd,tkd->tqk", Qh, Kh,
                                 preferred_element_type=f32))       # (T, S, S)
    s_all = jnp.concatenate(scores, axis=0)                         # (HEADS*T, S, S)
    m = jnp.max(s_all, axis=-1, keepdims=True)
    p = jnp.exp(s_all - m)
    p = p * pl.reciprocal(jnp.sum(p, axis=-1, keepdims=True), approx=True)
    p = p.astype(bf16)

    head_outs = []
    for h in range(HEADS):
        lo = h * Dh
        Vh = Vp3[:, :, lo:lo + Dh].astype(bf16)
        head_outs.append(jnp.einsum("tqk,tkd->tqd", p[h * T:(h + 1) * T], Vh,
                                    preferred_element_type=f32))    # (T, S, Dh)
    headcat3 = jnp.concatenate(head_outs, axis=-1)                  # (T, S, E)

    # ---- out_proj ∘ (+residual) ∘ linear ∘ flatten ∘ fc1 : one folded contraction ----
    # fc1 slab rows: [0:SE) flat path, [SE:2SE) attention path (WoT folded),
    #                [2SE:2SE+A) infos path, [2SE+A] folded bias.
    infos_bf = infos_ref[...].astype(bf16)
    h1 = jnp.dot(infos_bf, fc1_ref[pl.ds(2 * SE, A), :], preferred_element_type=f32)
    h1 = h1 + fc1_ref[pl.ds(2 * SE + A, 1), :].astype(f32)          # (T, 512)
    for s in range(S):
        h1 = h1 + jnp.dot(flat3[:, s, :].astype(bf16),
                          fc1_ref[pl.ds(s * E, E), :],
                          preferred_element_type=f32)
        h1 = h1 + jnp.dot(headcat3[:, s, :].astype(bf16),
                          fc1_ref[pl.ds(SE + s * E, E), :],
                          preferred_element_type=f32)
    h1 = jnp.where(h1 > 0, h1, 0.01 * h1)                           # LeakyReLU

    # ---- rest of the final MLP, batched over the tile ----
    h2 = jnp.dot(h1.astype(bf16), fc2_ref[pl.ds(0, 512), :],
                 preferred_element_type=f32) + fc2_ref[pl.ds(512, 1), :].astype(f32)
    h2 = jnp.where(h2 > 0, h2, 0.01 * h2)                           # (T, 256)
    h3 = jnp.dot(h2.astype(bf16), fc3_ref[pl.ds(0, 256), :],
                 preferred_element_type=f32) + fc3_ref[pl.ds(256, 1), :].astype(f32)
    out_ref[...] = jnp.maximum(h3, 0.0)                             # ReLU, (T, 128) lane-dense


# --------------------------- params (deterministic) -------------------------

def init_params(key, cfg):
    H, W = cfg["num_of_eqp"], cfg["num_of_status"]
    Cin, Cout = cfg["in_channel_size"], cfg["out_channel_size"]
    E = H * W
    S = Cout
    CL, A, OF = cfg["cluster_num"], cfg["additional_infos"], cfg["out_feature_size"]
    KH, KW = H, 3
    K2C = KH * KW * Cin
    HEADS = cfg["num_of_eqp"]
    assert E % HEADS == 0
    eps = 1e-5
    OF_PAD = 128
    bf16 = jnp.bfloat16

    keys = iter(jax.random.split(key, 64))

    def nrm(shape, scale=0.1):
        return scale * jax.random.normal(next(keys), shape, jnp.float32)

    def uni(shape, lo, hi):
        return jax.random.uniform(next(keys), shape, jnp.float32, lo, hi)

    p = {}

    # --- eqp_conv_block: depthwise Conv2d + 1x1 Conv2d + BN2d(eval), folded ---
    dw_w = nrm((Cin, KH, KW))
    dw_b = nrm((Cin,))
    pw_w = nrm((Cout, Cin))
    pw_b = nrm((Cout,))
    g2, be2 = uni((Cout,), 0.8, 1.2), nrm((Cout,))
    mu2, var2 = nrm((Cout,)), uni((Cout,), 0.5, 1.5)
    s2 = g2 / jnp.sqrt(var2 + eps)
    comp = jnp.einsum("cij,oc->oijc", dw_w, pw_w).reshape(Cout, K2C)
    conv_w = comp * s2[:, None]
    conv_shift = ((pw_w @ dw_b + pw_b) * s2 + (be2 - mu2 * s2)).reshape(Cout, 1)
    p["conv"] = jnp.concatenate([conv_w, conv_shift], axis=1).astype(bf16)     # (S, K2C+1)

    # --- q/k/v Conv1d(k=3,'same') + BN1d(eval): one merged (3S, 3S) weight ---
    blocks, shifts = [], []
    for _ in range(3):                                             # q, k, v
        cw = nrm((Cout, Cout, 3))
        cb = nrm((Cout,))
        g, be = uni((Cout,), 0.8, 1.2), nrm((Cout,))
        mu, var = nrm((Cout,)), uni((Cout,), 0.5, 1.5)
        sc = g / jnp.sqrt(var + eps)
        blocks.append(jnp.concatenate([cw[:, :, t] * sc[:, None] for t in range(3)], axis=1))
        shifts.append((cb * sc + (be - mu * sc)).reshape(Cout, 1))
    qkv_w = jnp.concatenate(blocks, axis=0)                        # (3S, 3S)
    qkv_shift = jnp.concatenate(shifts, axis=0)                    # (3S, 1)
    p["qkv"] = jnp.concatenate([qkv_w, qkv_shift], axis=1).astype(bf16)        # (3S, 3S+1)

    # --- MultiheadAttention in-projection (out-projection folded into fc1) ---
    in_proj_w = nrm((3 * E, E))
    in_proj_b = nrm((3 * E,))
    wo, bo = nrm((E, E)), nrm((E,))
    p["mha"] = jnp.concatenate(
        [in_proj_w[:E].T, in_proj_w[E:2 * E].T, in_proj_w[2 * E:].T,
         in_proj_b[:E].reshape(1, E), in_proj_b[E:2 * E].reshape(1, E),
         in_proj_b[2 * E:].reshape(1, E)], axis=0).astype(bf16)                # (3E+3, E)

    # --- out_proj ∘ (+residual) ∘ linear ∘ flatten ∘ final Linear#1, folded ---
    lin_w, lin_b = nrm((CL, E)), nrm((CL,))
    w1, b1 = nrm((512, S * CL + A)), nrm((512,))
    w1_f = w1[:, :S * CL].reshape(512, S, CL)                      # w1[f, s*CL + c]
    Wbig = jnp.einsum("ce,fsc->sef", lin_w, w1_f)                  # flat/residual path
    Wbig_att = jnp.einsum("de,sef->sdf", wo.T, Wbig)               # attention path (WoT folded)
    Winfo = w1[:, S * CL:].T                                       # (A, 512)
    b1_eff = (b1 + jnp.einsum("c,fsc->f", lin_b, w1_f)
              + jnp.einsum("e,sef->f", bo, Wbig)).reshape(1, 512)
    p["fc1"] = jnp.concatenate(
        [Wbig.reshape(S * E, 512), Wbig_att.reshape(S * E, 512),
         Winfo, b1_eff], axis=0).astype(bf16)                      # (2*S*E + A + 1, 512)

    # --- final MLP layers 2, 3 (output padded to 128 lanes for dense stores) ---
    w2, b2 = nrm((256, 512)), nrm((256,))
    p["fc2"] = jnp.concatenate([w2.T, b2.reshape(1, 256)], axis=0).astype(bf16)  # (513, 256)
    w3, b3 = nrm((OF, 256)), nrm((OF,))
    w3T = jnp.zeros((256, OF_PAD), jnp.float32).at[:, :OF].set(w3.T)
    b3p = jnp.zeros((1, OF_PAD), jnp.float32).at[:, :OF].set(b3.reshape(1, OF))
    p["fc3"] = jnp.concatenate([w3T, b3p], axis=0).astype(bf16)                  # (257, 128)
    return p


# --------------------------------- forward ---------------------------------

def forward(cfg, params, lagged_sn_count, lagged_infos, lagged_eqp_status_block):
    del lagged_sn_count                          # unused by the reference forward
    H, W = cfg["num_of_eqp"], cfg["num_of_status"]
    Cin, Cout = cfg["in_channel_size"], cfg["out_channel_size"]
    E = H * W
    S = Cout
    A, OF = cfg["additional_infos"], cfg["out_feature_size"]
    HEADS = cfg["num_of_eqp"]
    KH, KW = H, 3
    K2C = KH * KW * Cin
    OF_PAD = 128
    B = lagged_eqp_status_block.shape[0]

    # Batch tile: fold the whole batch into the matmul lanes when small; for
    # larger batches use tiles whose lane width (T*E) is a multiple of 128.
    T = B if B <= 8 else 8
    if B > T:
        while (T * E) % 128 != 0:
            T *= 2
    B_pad = -(-B // T) * T
    n_tiles = B_pad // T

    x = lagged_eqp_status_block.astype(jnp.float32)                # (B, Cin, H, W)
    # PyTorch padding='same' (asymmetric for the even kernel height).
    pad_t, pad_b = (KH - 1) // 2, (KH - 1) - (KH - 1) // 2
    pad_l, pad_r = (KW - 1) // 2, (KW - 1) - (KW - 1) // 2
    xpad = jnp.pad(x, ((0, 0), (0, 0), (pad_t, pad_b), (pad_l, pad_r)))
    # im2col: patches[b, (i*KW+j)*Cin + c, h*W + w] = xpad[b, c, h+i, w+j]
    cols = [xpad[:, :, i:i + H, j:j + W].reshape(B, Cin, E)
            for i in range(KH) for j in range(KW)]
    patches = jnp.concatenate(cols, axis=1)                        # (B, K2C, E)
    if B_pad != B:
        patches = jnp.pad(patches, ((0, B_pad - B), (0, 0), (0, 0)))
    # conv-space layout: columns are (example, position) = b*E + e
    patches_cm = jnp.transpose(patches, (1, 0, 2)).reshape(K2C, B_pad * E)
    patches_cm = patches_cm.astype(jnp.bfloat16)

    infos = lagged_infos.astype(jnp.float32)
    if B_pad != B:
        infos = jnp.pad(infos, ((0, B_pad - B), (0, 0)))

    kernel = functools.partial(fused_forward_kernel, T, E, S, HEADS, A, K2C)
    out = pl.pallas_call(
        kernel,
        grid=(n_tiles,),
        in_specs=[
            pl.BlockSpec((K2C, T * E), lambda i: (0, i)),          # im2col patches (per tile)
            pl.BlockSpec((T, A), lambda i: (i, 0)),                # lagged_infos   (per tile)
            pl.BlockSpec(params["conv"].shape, lambda i: (0, 0)),  # conv slab
            pl.BlockSpec(params["qkv"].shape, lambda i: (0, 0)),   # qkv slab
            pl.BlockSpec(params["mha"].shape, lambda i: (0, 0)),   # MHA in-proj slab
            pl.BlockSpec(params["fc1"].shape, lambda i: (0, 0)),   # folded fc1 slab
            pl.BlockSpec(params["fc2"].shape, lambda i: (0, 0)),   # fc2 slab
            pl.BlockSpec(params["fc3"].shape, lambda i: (0, 0)),   # fc3 slab (lane-padded)
        ],
        out_specs=pl.BlockSpec((T, OF_PAD), lambda i: (i, 0)),
        out_shape=jax.ShapeDtypeStruct((B_pad, OF_PAD), jnp.float32),
        compiler_params=pltpu.CompilerParams(
            dimension_semantics=("parallel",)),
    )(patches_cm, infos,
      params["conv"], params["qkv"], params["mha"],
      params["fc1"], params["fc2"], params["fc3"])
    return out[:B, :OF]


# ----------------------------------- main -----------------------------------

if __name__ == "__main__":
    cfg = dict(num_of_eqp=4, num_of_status=8, additional_infos=6, cluster_num=3,
               in_channel_size=8, out_channel_size=8, out_feature_size=1)
    B = 2

    key = jax.random.PRNGKey(0)
    kp, k1, k2, k3 = jax.random.split(key, 4)
    params = init_params(kp, cfg)

    lagged_sn_count = jax.random.normal(k1, (B, cfg["num_of_eqp"]), jnp.float32)  # unused by forward
    lagged_infos = jax.random.normal(k2, (B, cfg["additional_infos"]), jnp.float32)
    lagged_eqp_status_block = jax.random.normal(
        k3, (B, cfg["in_channel_size"], cfg["num_of_eqp"], cfg["num_of_status"]),
        jnp.float32)

    fwd = jax.jit(functools.partial(forward, cfg))
    out = fwd(params, lagged_sn_count, lagged_infos, lagged_eqp_status_block)
    out = jax.block_until_ready(out)

    assert out.shape == (B, cfg["out_feature_size"]), out.shape
    assert bool(jnp.all(jnp.isfinite(out)))
    print("KERNEL_OK")
</pallas_src>

<mosaic_0001>
module attributes {stable_mosaic.version = 11 : i64} {
  func.func @fused_forward_kernel(%arg0: i32, %arg1: memref<96x64xbf16, #tpu.memory_space<vmem>>, %arg2: memref<2x6xf32, #tpu.memory_space<vmem>>, %arg3: memref<8x97xbf16, #tpu.memory_space<vmem>>, %arg4: memref<24x25xbf16, #tpu.memory_space<vmem>>, %arg5: memref<99x32xbf16, #tpu.memory_space<vmem>>, %arg6: memref<519x512xbf16, #tpu.memory_space<vmem>>, %arg7: memref<513x256xbf16, #tpu.memory_space<vmem>>, %arg8: memref<257x128xbf16, #tpu.memory_space<vmem>>, %arg9: memref<2x128xf32, #tpu.memory_space<vmem>>) attributes {dimension_semantics = [#tpu.dimension_semantics<parallel>], iteration_bounds = array<i64: 1>, scalar_prefetch = 0 : i64, scratch_operands = 0 : i64, tpu.core_type = #tpu.core_type<tc>, window_params = [{transform_indices = @transform_0, window_bounds = array<i64: 96, 64>}, {transform_indices = @transform_1, window_bounds = array<i64: 2, 6>}, {pipeline_mode = #tpu.pipeline_mode<synchronous>, transform_indices = @transform_2, window_bounds = array<i64: 8, 97>}, {pipeline_mode = #tpu.pipeline_mode<synchronous>, transform_indices = @transform_3, window_bounds = array<i64: 24, 25>}, {pipeline_mode = #tpu.pipeline_mode<synchronous>, transform_indices = @transform_4, window_bounds = array<i64: 99, 32>}, {pipeline_mode = #tpu.pipeline_mode<synchronous>, transform_indices = @transform_5, window_bounds = array<i64: 519, 512>}, {pipeline_mode = #tpu.pipeline_mode<synchronous>, transform_indices = @transform_6, window_bounds = array<i64: 513, 256>}, {pipeline_mode = #tpu.pipeline_mode<synchronous>, transform_indices = @transform_7, window_bounds = array<i64: 257, 128>}, {transform_indices = @transform_8, window_bounds = array<i64: 2, 128>}]} {
    %c0 = arith.constant 0 : index
    %c0_0 = arith.constant 0 : index
    %0 = vector.load %arg3[%c0, %c0_0] : memref<8x97xbf16, #tpu.memory_space<vmem>>, vector<8x97xbf16>
    %1 = vector.extract_strided_slice %0 {offsets = [0, 0], sizes = [8, 96], strides = [1, 1]} : vector<8x97xbf16> to vector<8x96xbf16>
    %2 = vector.extract_strided_slice %0 {offsets = [0, 96], sizes = [8, 1], strides = [1, 1]} : vector<8x97xbf16> to vector<8x1xbf16>
    %3 = arith.extf %2 : vector<8x1xbf16> to vector<8x1xf32>
    %c0_1 = arith.constant 0 : index
    %c0_2 = arith.constant 0 : index
    %4 = vector.load %arg4[%c0_1, %c0_2] : memref<24x25xbf16, #tpu.memory_space<vmem>>, vector<24x25xbf16>
    %5 = vector.extract_strided_slice %4 {offsets = [0, 0], sizes = [24, 24], strides = [1, 1]} : vector<24x25xbf16> to vector<24x24xbf16>
    %6 = vector.extract_strided_slice %4 {offsets = [0, 24], sizes = [24, 1], strides = [1, 1]} : vector<24x25xbf16> to vector<24x1xbf16>
    %7 = arith.extf %6 : vector<24x1xbf16> to vector<24x1xf32>
    %c0_3 = arith.constant 0 : index
    %c0_4 = arith.constant 0 : index
    %8 = vector.load %arg5[%c0_3, %c0_4] : memref<99x32xbf16, #tpu.memory_space<vmem>>, vector<99x32xbf16>
    %9 = vector.extract_strided_slice %8 {offsets = [0, 0], sizes = [32, 32], strides = [1, 1]} : vector<99x32xbf16> to vector<32x32xbf16>
    %10 = vector.extract_strided_slice %8 {offsets = [32, 0], sizes = [32, 32], strides = [1, 1]} : vector<99x32xbf16> to vector<32x32xbf16>
    %11 = vector.extract_strided_slice %8 {offsets = [64, 0], sizes = [32, 32], strides = [1, 1]} : vector<99x32xbf16> to vector<32x32xbf16>
    %12 = vector.extract_strided_slice %8 {offsets = [96, 0], sizes = [1, 32], strides = [1, 1]} : vector<99x32xbf16> to vector<1x32xbf16>
    %13 = arith.extf %12 : vector<1x32xbf16> to vector<1x32xf32>
    %14 = vector.extract_strided_slice %8 {offsets = [97, 0], sizes = [1, 32], strides = [1, 1]} : vector<99x32xbf16> to vector<1x32xbf16>
    %15 = arith.extf %14 : vector<1x32xbf16> to vector<1x32xf32>
    %16 = vector.extract_strided_slice %8 {offsets = [98, 0], sizes = [1, 32], strides = [1, 1]} : vector<99x32xbf16> to vector<1x32xbf16>
    %17 = arith.extf %16 : vector<1x32xbf16> to vector<1x32xf32>
    %c0_5 = arith.constant 0 : index
    %c0_6 = arith.constant 0 : index
    %18 = vector.load %arg1[%c0_5, %c0_6] : memref<96x64xbf16, #tpu.memory_space<vmem>>, vector<96x64xbf16>
    %cst = arith.constant dense<0.000000e+00> : vector<8x64xf32>
    %19 = tpu.matmul %1, %18, %cst {dimension_numbers = #tpu.dot_dimension_numbers<[1], [0], [0], [1], [0, 0, 1, 1], [], []>} : vector<8x96xbf16>, vector<96x64xbf16>, vector<8x64xf32> -> vector<8x64xf32>
    %20 = vector.broadcast %3 : vector<8x1xf32> to vector<8x64xf32>
    %21 = arith.addf %19, %20 : vector<8x64xf32>
    %cst_7 = arith.constant 0.000000e+00 : f32
    %22 = vector.broadcast %cst_7 : f32 to vector<8x64xf32>
    %23 = arith.cmpf ogt, %21, %22 : vector<8x64xf32>
    %cst_8 = arith.constant 0.00999999977 : f32
    %24 = vector.broadcast %cst_8 : f32 to vector<8x64xf32>
    %25 = arith.mulf %24, %21 : vector<8x64xf32>
    %26 = arith.select %23, %21, %25 : vector<8x64xi1>, vector<8x64xf32>
    %cst_9 = arith.constant 0.000000e+00 : f32
    %27 = vector.broadcast %cst_9 : f32 to vector<8x1xf32>
    %28 = vector.extract_strided_slice %26 {offsets = [0, 0], sizes = [8, 63], strides = [1, 1]} : vector<8x64xf32> to vector<8x63xf32>
    %29 = tpu.concatenate %27, %28 in 1 : vector<8x1xf32>, vector<8x63xf32> -> vector<8x64xf32>
    %30 = vector.extract_strided_slice %26 {offsets = [0, 1], sizes = [8, 63], strides = [1, 1]} : vector<8x64xf32> to vector<8x63xf32>
    %31 = tpu.concatenate %30, %27 in 1 : vector<8x63xf32>, vector<8x1xf32> -> vector<8x64xf32>
    %32 = tpu.iota {dimensions = array<i32: 1>} : vector<8x64xi32>
    %c32_i32 = arith.constant 32 : i32
    %c0_i32 = arith.constant 0 : i32
    %33 = arith.cmpi eq, %c32_i32, %c0_i32 : i32
    %c1_i32 = arith.constant 1 : i32
    %34 = arith.select %33, %c1_i32, %c32_i32 : i32
    %35 = vector.broadcast %34 : i32 to vector<8x64xi32>
    %36 = arith.remsi %32, %35 : vector<8x64xi32>
    %c0_i32_10 = arith.constant 0 : i32
    %37 = vector.broadcast %c0_i32_10 : i32 to vector<8x64xi32>
    %38 = arith.cmpi ne, %36, %37 : vector<8x64xi32>
    %c0_i32_11 = arith.constant 0 : i32
    %39 = vector.broadcast %c0_i32_11 : i32 to vector<8x64xi32>
    %40 = arith.cmpi slt, %36, %39 : vector<8x64xi32>
    %c0_i32_12 = arith.constant 0 : i32
    %41 = arith.cmpi slt, %34, %c0_i32_12 : i32
    %42 = vector.broadcast %41 : i1 to vector<8x64xi1>
    %43 = vector.broadcast %42 : vector<8x64xi1> to vector<8x64xi1>
    %44 = arith.xori %40, %43 : vector<8x64xi1>
    %45 = arith.andi %44, %38 : vector<8x64xi1>
    %46 = vector.broadcast %34 : i32 to vector<8x64xi32>
    %47 = arith.addi %36, %46 : vector<8x64xi32>
    %48 = arith.select %45, %47, %36 : vector<8x64xi1>, vector<8x64xi32>
    %c0_i32_13 = arith.constant 0 : i32
    %49 = vector.broadcast %c0_i32_13 : i32 to vector<8x64xi32>
    %50 = arith.cmpi eq, %48, %49 : vector<8x64xi32>
    %cst_14 = arith.constant 0.000000e+00 : f32
    %51 = vector.broadcast %cst_14 : f32 to vector<8x64xf32>
    %52 = arith.select %50, %51, %29 : vector<8x64xi1>, vector<8x64xf32>
    %c31_i32 = arith.constant 31 : i32
    %53 = vector.broadcast %c31_i32 : i32 to vector<8x64xi32>
    %54 = arith.cmpi eq, %48, %53 : vector<8x64xi32>
    %cst_15 = arith.constant 0.000000e+00 : f32
    %55 = vector.broadcast %cst_15 : f32 to vector<8x64xf32>
    %56 = arith.select %54, %55, %31 : vector<8x64xi1>, vector<8x64xf32>
    %57 = tpu.concatenate %52, %26, %56 in 0 : vector<8x64xf32>, vector<8x64xf32>, vector<8x64xf32> -> vector<24x64xf32>
    %58 = arith.truncf %57 : vector<24x64xf32> to vector<24x64xbf16>
    %cst_16 = arith.constant dense<0.000000e+00> : vector<24x64xf32>
    %59 = tpu.matmul %5, %58, %cst_16 {dimension_numbers = #tpu.dot_dimension_numbers<[1], [0], [0], [1], [0, 0, 1, 1], [], []>} : vector<24x24xbf16>, vector<24x64xbf16>, vector<24x64xf32> -> vector<24x64xf32>
    %60 = vector.broadcast %7 : vector<24x1xf32> to vector<24x64xf32>
    %61 = arith.addf %59, %60 : vector<24x64xf32>
    %62 = vector.extract_strided_slice %61 {offsets = [0, 0], sizes = [8, 64], strides = [1, 1]} : vector<24x64xf32> to vector<8x64xf32>
    %63 = vector.extract_strided_slice %61 {offsets = [8, 0], sizes = [8, 64], strides = [1, 1]} : vector<24x64xf32> to vector<8x64xf32>
    %64 = vector.extract_strided_slice %61 {offsets = [16, 0], sizes = [8, 64], strides = [1, 1]} : vector<24x64xf32> to vector<8x64xf32>
    %65 = vector.extract_strided_slice %62 {offsets = [0, 0], sizes = [8, 32], strides = [1, 1]} : vector<8x64xf32> to vector<8x32xf32>
    %66 = vector.extract_strided_slice %62 {offsets = [0, 32], sizes = [8, 32], strides = [1, 1]} : vector<8x64xf32> to vector<8x32xf32>
    %67 = tpu.concatenate %65, %66 in 0 : vector<8x32xf32>, vector<8x32xf32> -> vector<16x32xf32>
    %68 = vector.extract_strided_slice %63 {offsets = [0, 0], sizes = [8, 32], strides = [1, 1]} : vector<8x64xf32> to vector<8x32xf32>
    %69 = vector.extract_strided_slice %63 {offsets = [0, 32], sizes = [8, 32], strides = [1, 1]} : vector<8x64xf32> to vector<8x32xf32>
    %70 = tpu.concatenate %68, %69 in 0 : vector<8x32xf32>, vector<8x32xf32> -> vector<16x32xf32>
    %71 = vector.extract_strided_slice %64 {offsets = [0, 0], sizes = [8, 32], strides = [1, 1]} : vector<8x64xf32> to vector<8x32xf32>
    %72 = vector.extract_strided_slice %64 {offsets = [0, 32], sizes = [8, 32], strides = [1, 1]} : vector<8x64xf32> to vector<8x32xf32>
    %73 = tpu.concatenate %71, %72 in 0 : vector<8x32xf32>, vector<8x32xf32> -> vector<16x32xf32>
    %74 = vector.extract_strided_slice %26 {offsets = [0, 0], sizes = [8, 32], strides = [1, 1]} : vector<8x64xf32> to vector<8x32xf32>
    %75 = vector.extract_strided_slice %26 {offsets = [0, 32], sizes = [8, 32], strides = [1, 1]} : vector<8x64xf32> to vector<8x32xf32>
    %76 = vector.shape_cast %74 : vector<8x32xf32> to vector<1x8x32xf32>
    %77 = vector.shape_cast %75 : vector<8x32xf32> to vector<1x8x32xf32>
    %78 = tpu.concatenate %76, %77 in 0 : vector<1x8x32xf32>, vector<1x8x32xf32> -> vector<2x8x32xf32>
    %79 = arith.truncf %67 : vector<16x32xf32> to vector<16x32xbf16>
    %cst_17 = arith.constant dense<0.000000e+00> : vector<16x32xf32>
    %80 = tpu.matmul %79, %9, %cst_17 {dimension_numbers = #tpu.dot_dimension_numbers<[1], [0], [0], [1], [0, 0, 1, 1], [], []>} : vector<16x32xbf16>, vector<32x32xbf16>, vector<16x32xf32> -> vector<16x32xf32>
    %81 = vector.broadcast %13 : vector<1x32xf32> to vector<16x32xf32>
    %82 = arith.addf %80, %81 : vector<16x32xf32>
    %83 = arith.truncf %70 : vector<16x32xf32> to vector<16x32xbf16>
    %cst_18 = arith.constant dense<0.000000e+00> : vector<16x32xf32>
    %84 = tpu.matmul %83, %10, %cst_18 {dimension_numbers = #tpu.dot_dimension_numbers<[1], [0], [0], [1], [0, 0, 1, 1], [], []>} : vector<16x32xbf16>, vector<32x32xbf16>, vector<16x32xf32> -> vector<16x32xf32>
    %85 = vector.broadcast %15 : vector<1x32xf32> to vector<16x32xf32>
    %86 = arith.addf %84, %85 : vector<16x32xf32>
    %87 = arith.truncf %73 : vector<16x32xf32> to vector<16x32xbf16>
    %cst_19 = arith.constant dense<0.000000e+00> : vector<16x32xf32>
    %88 = tpu.matmul %87, %11, %cst_19 {dimension_numbers = #tpu.dot_dimension_numbers<[1], [0], [0], [1], [0, 0, 1, 1], [], []>} : vector<16x32xbf16>, vector<32x32xbf16>, vector<16x32xf32> -> vector<16x32xf32>
    %89 = vector.broadcast %17 : vector<1x32xf32> to vector<16x32xf32>
    %90 = arith.addf %88, %89 : vector<16x32xf32>
    %91 = vector.extract_strided_slice %82 {offsets = [0, 0], sizes = [8, 32], strides = [1, 1]} : vector<16x32xf32> to vector<8x32xf32>
    %92 = vector.extract_strided_slice %82 {offsets = [8, 0], sizes = [8, 32], strides = [1, 1]} : vector<16x32xf32> to vector<8x32xf32>
    %93 = vector.shape_cast %91 : vector<8x32xf32> to vector<1x8x32xf32>
    %94 = vector.shape_cast %92 : vector<8x32xf32> to vector<1x8x32xf32>
    %95 = tpu.concatenate %93, %94 in 0 : vector<1x8x32xf32>, vector<1x8x32xf32> -> vector<2x8x32xf32>
    %96 = vector.extract_strided_slice %86 {offsets = [0, 0], sizes = [8, 32], strides = [1, 1]} : vector<16x32xf32> to vector<8x32xf32>
    %97 = vector.extract_strided_slice %86 {offsets = [8, 0], sizes = [8, 32], strides = [1, 1]} : vector<16x32xf32> to vector<8x32xf32>
    %98 = vector.shape_cast %96 : vector<8x32xf32> to vector<1x8x32xf32>
    %99 = vector.shape_cast %97 : vector<8x32xf32> to vector<1x8x32xf32>
    %100 = tpu.concatenate %98, %99 in 0 : vector<1x8x32xf32>, vector<1x8x32xf32> -> vector<2x8x32xf32>
    %101 = vector.extract_strided_slice %90 {offsets = [0, 0], sizes = [8, 32], strides = [1, 1]} : vector<16x32xf32> to vector<8x32xf32>
    %102 = vector.extract_strided_slice %90 {offsets = [8, 0], sizes = [8, 32], strides = [1, 1]} : vector<16x32xf32> to vector<8x32xf32>
    %103 = vector.shape_cast %101 : vector<8x32xf32> to vector<1x8x32xf32>
    %104 = vector.shape_cast %102 : vector<8x32xf32> to vector<1x8x32xf32>
    %105 = tpu.concatenate %103, %104 in 0 : vector<1x8x32xf32>, vector<1x8x32xf32> -> vector<2x8x32xf32>
    %106 = vector.extract_strided_slice %95 {offsets = [0, 0, 0], sizes = [2, 8, 8], strides = [1, 1, 1]} : vector<2x8x32xf32> to vector<2x8x8xf32>
    %cst_20 = arith.constant 0.353553385 : f32
    %107 = vector.broadcast %cst_20 : f32 to vector<2x8x8xf32>
    %108 = arith.mulf %106, %107 : vector<2x8x8xf32>
    %109 = arith.truncf %108 : vector<2x8x8xf32> to vector<2x8x8xbf16>
    %110 = vector.extract_strided_slice %100 {offsets = [0, 0, 0], sizes = [2, 8, 8], strides = [1, 1, 1]} : vector<2x8x32xf32> to vector<2x8x8xf32>
    %111 = arith.truncf %110 : vector<2x8x8xf32> to vector<2x8x8xbf16>
    "tpu.trace_start"() <{level = 10 : i32, message = "tqd,tkd->tqk"}> : () -> ()
    %cst_21 = arith.constant dense<0.000000e+00> : vector<2x8x8xf32>
    %112 = tpu.matmul %109, %111, %cst_21 {dimension_numbers = #tpu.dot_dimension_numbers<[2], [2], [1], [1], [0, 0, 0, 1, 1, 1], [0], [0]>} : vector<2x8x8xbf16>, vector<2x8x8xbf16>, vector<2x8x8xf32> -> vector<2x8x8xf32>
    "tpu.trace_stop"() : () -> ()
    %113 = vector.extract_strided_slice %95 {offsets = [0, 0, 8], sizes = [2, 8, 8], strides = [1, 1, 1]} : vector<2x8x32xf32> to vector<2x8x8xf32>
    %cst_22 = arith.constant 0.353553385 : f32
    %114 = vector.broadcast %cst_22 : f32 to vector<2x8x8xf32>
    %115 = arith.mulf %113, %114 : vector<2x8x8xf32>
    %116 = arith.truncf %115 : vector<2x8x8xf32> to vector<2x8x8xbf16>
    %117 = vector.extract_strided_slice %100 {offsets = [0, 0, 8], sizes = [2, 8, 8], strides = [1, 1, 1]} : vector<2x8x32xf32> to vector<2x8x8xf32>
    %118 = arith.truncf %117 : vector<2x8x8xf32> to vector<2x8x8xbf16>
    "tpu.trace_start"() <{level = 10 : i32, message = "tqd,tkd->tqk"}> : () -> ()
    %cst_23 = arith.constant dense<0.000000e+00> : vector<2x8x8xf32>
    %119 = tpu.matmul %116, %118, %cst_23 {dimension_numbers = #tpu.dot_dimension_numbers<[2], [2], [1], [1], [0, 0, 0, 1, 1, 1], [0], [0]>} : vector<2x8x8xbf16>, vector<2x8x8xbf16>, vector<2x8x8xf32> -> vector<2x8x8xf32>
    "tpu.trace_stop"() : () -> ()
    %120 = vector.extract_strided_slice %95 {offsets = [0, 0, 16], sizes = [2, 8, 8], strides = [1, 1, 1]} : vector<2x8x32xf32> to vector<2x8x8xf32>
    %cst_24 = arith.constant 0.353553385 : f32
    %121 = vector.broadcast %cst_24 : f32 to vector<2x8x8xf32>
    %122 = arith.mulf %120, %121 : vector<2x8x8xf32>
    %123 = arith.truncf %122 : vector<2x8x8xf32> to vector<2x8x8xbf16>
    %124 = vector.extract_strided_slice %100 {offsets = [0, 0, 16], sizes = [2, 8, 8], strides = [1, 1, 1]} : vector<2x8x32xf32> to vector<2x8x8xf32>
    %125 = arith.truncf %124 : vector<2x8x8xf32> to vector<2x8x8xbf16>
    "tpu.trace_start"() <{level = 10 : i32, message = "tqd,tkd->tqk"}> : () -> ()
    %cst_25 = arith.constant dense<0.000000e+00> : vector<2x8x8xf32>
    %126 = tpu.matmul %123, %125, %cst_25 {dimension_numbers = #tpu.dot_dimension_numbers<[2], [2], [1], [1], [0, 0, 0, 1, 1, 1], [0], [0]>} : vector<2x8x8xbf16>, vector<2x8x8xbf16>, vector<2x8x8xf32> -> vector<2x8x8xf32>
    "tpu.trace_stop"() : () -> ()
    %127 = vector.extract_strided_slice %95 {offsets = [0, 0, 24], sizes = [2, 8, 8], strides = [1, 1, 1]} : vector<2x8x32xf32> to vector<2x8x8xf32>
    %cst_26 = arith.constant 0.353553385 : f32
    %128 = vector.broadcast %cst_26 : f32 to vector<2x8x8xf32>
    %129 = arith.mulf %127, %128 : vector<2x8x8xf32>
    %130 = arith.truncf %129 : vector<2x8x8xf32> to vector<2x8x8xbf16>
    %131 = vector.extract_strided_slice %100 {offsets = [0, 0, 24], sizes = [2, 8, 8], strides = [1, 1, 1]} : vector<2x8x32xf32> to vector<2x8x8xf32>
    %132 = arith.truncf %131 : vector<2x8x8xf32> to vector<2x8x8xbf16>
    "tpu.trace_start"() <{level = 10 : i32, message = "tqd,tkd->tqk"}> : () -> ()
    %cst_27 = arith.constant dense<0.000000e+00> : vector<2x8x8xf32>
    %133 = tpu.matmul %130, %132, %cst_27 {dimension_numbers = #tpu.dot_dimension_numbers<[2], [2], [1], [1], [0, 0, 0, 1, 1, 1], [0], [0]>} : vector<2x8x8xbf16>, vector<2x8x8xbf16>, vector<2x8x8xf32> -> vector<2x8x8xf32>
    "tpu.trace_stop"() : () -> ()
    %134 = tpu.concatenate %112, %119, %126, %133 in 0 : vector<2x8x8xf32>, vector<2x8x8xf32>, vector<2x8x8xf32>, vector<2x8x8xf32> -> vector<8x8x8xf32>
    %cst_28 = arith.constant dense<0xFF800000> : vector<8x8xf32>
    %135 = vector.multi_reduction <maximumf>, %134, %cst_28 [2] : vector<8x8x8xf32> to vector<8x8xf32>
    %136 = vector.shape_cast %135 : vector<8x8xf32> to vector<8x8x1xf32>
    %137 = vector.broadcast %136 : vector<8x8x1xf32> to vector<8x8x8xf32>
    %138 = arith.subf %134, %137 : vector<8x8x8xf32>
    %139 = math.exp %138 : vector<8x8x8xf32>
    %cst_29 = arith.constant dense<0.000000e+00> : vector<8x8xf32>
    %140 = vector.multi_reduction <add>, %139, %cst_29 [2] : vector<8x8x8xf32> to vector<8x8xf32>
    %141 = vector.shape_cast %140 : vector<8x8xf32> to vector<8x8x1xf32>
    %142 = tpu.reciprocal %141 {approx = true} : vector<8x8x1xf32> -> vector<8x8x1xf32>
    %143 = vector.broadcast %142 : vector<8x8x1xf32> to vector<8x8x8xf32>
    %144 = arith.mulf %139, %143 : vector<8x8x8xf32>
    %145 = arith.truncf %144 : vector<8x8x8xf32> to vector<8x8x8xbf16>
    %146 = vector.extract_strided_slice %105 {offsets = [0, 0, 0], sizes = [2, 8, 8], strides = [1, 1, 1]} : vector<2x8x32xf32> to vector<2x8x8xf32>
    %147 = arith.truncf %146 : vector<2x8x8xf32> to vector<2x8x8xbf16>
    %148 = vector.extract_strided_slice %145 {offsets = [0, 0, 0], sizes = [2, 8, 8], strides = [1, 1, 1]} : vector<8x8x8xbf16> to vector<2x8x8xbf16>
    "tpu.trace_start"() <{level = 10 : i32, message = "tqk,tkd->tqd"}> : () -> ()
    %cst_30 = arith.constant dense<0.000000e+00> : vector<2x8x8xf32>
    %149 = tpu.matmul %148, %147, %cst_30 {dimension_numbers = #tpu.dot_dimension_numbers<[2], [1], [1], [2], [0, 0, 0, 1, 1, 2], [0], [0]>} : vector<2x8x8xbf16>, vector<2x8x8xbf16>, vector<2x8x8xf32> -> vector<2x8x8xf32>
    "tpu.trace_stop"() : () -> ()
    %150 = vector.extract_strided_slice %105 {offsets = [0, 0, 8], sizes = [2, 8, 8], strides = [1, 1, 1]} : vector<2x8x32xf32> to vector<2x8x8xf32>
    %151 = arith.truncf %150 : vector<2x8x8xf32> to vector<2x8x8xbf16>
    %152 = vector.extract_strided_slice %145 {offsets = [2, 0, 0], sizes = [2, 8, 8], strides = [1, 1, 1]} : vector<8x8x8xbf16> to vector<2x8x8xbf16>
    "tpu.trace_start"() <{level = 10 : i32, message = "tqk,tkd->tqd"}> : () -> ()
    %cst_31 = arith.constant dense<0.000000e+00> : vector<2x8x8xf32>
    %153 = tpu.matmul %152, %151, %cst_31 {dimension_numbers = #tpu.dot_dimension_numbers<[2], [1], [1], [2], [0, 0, 0, 1, 1, 2], [0], [0]>} : vector<2x8x8xbf16>, vector<2x8x8xbf16>, vector<2x8x8xf32> -> vector<2x8x8xf32>
    "tpu.trace_stop"() : () -> ()
    %154 = vector.extract_strided_slice %105 {offsets = [0, 0, 16], sizes = [2, 8, 8], strides = [1, 1, 1]} : vector<2x8x32xf32> to vector<2x8x8xf32>
    %155 = arith.truncf %154 : vector<2x8x8xf32> to vector<2x8x8xbf16>
    %156 = vector.extract_strided_slice %145 {offsets = [4, 0, 0], sizes = [2, 8, 8], strides = [1, 1, 1]} : vector<8x8x8xbf16> to vector<2x8x8xbf16>
    "tpu.trace_start"() <{level = 10 : i32, message = "tqk,tkd->tqd"}> : () -> ()
    %cst_32 = arith.constant dense<0.000000e+00> : vector<2x8x8xf32>
    %157 = tpu.matmul %156, %155, %cst_32 {dimension_numbers = #tpu.dot_dimension_numbers<[2], [1], [1], [2], [0, 0, 0, 1, 1, 2], [0], [0]>} : vector<2x8x8xbf16>, vector<2x8x8xbf16>, vector<2x8x8xf32> -> vector<2x8x8xf32>
    "tpu.trace_stop"() : () -> ()
    %158 = vector.extract_strided_slice %105 {offsets = [0, 0, 24], sizes = [2, 8, 8], strides = [1, 1, 1]} : vector<2x8x32xf32> to vector<2x8x8xf32>
    %159 = arith.truncf %158 : vector<2x8x8xf32> to vector<2x8x8xbf16>
    %160 = vector.extract_strided_slice %145 {offsets = [6, 0, 0], sizes = [2, 8, 8], strides = [1, 1, 1]} : vector<8x8x8xbf16> to vector<2x8x8xbf16>
    "tpu.trace_start"() <{level = 10 : i32, message = "tqk,tkd->tqd"}> : () -> ()
    %cst_33 = arith.constant dense<0.000000e+00> : vector<2x8x8xf32>
    %161 = tpu.matmul %160, %159, %cst_33 {dimension_numbers = #tpu.dot_dimension_numbers<[2], [1], [1], [2], [0, 0, 0, 1, 1, 2], [0], [0]>} : vector<2x8x8xbf16>, vector<2x8x8xbf16>, vector<2x8x8xf32> -> vector<2x8x8xf32>
    "tpu.trace_stop"() : () -> ()
    %162 = tpu.concatenate %149, %153, %157, %161 in 2 : vector<2x8x8xf32>, vector<2x8x8xf32>, vector<2x8x8xf32>, vector<2x8x8xf32> -> vector<2x8x32xf32>
    %c0_34 = arith.constant 0 : index
    %c0_35 = arith.constant 0 : index
    %163 = vector.load %arg2[%c0_34, %c0_35] : memref<2x6xf32, #tpu.memory_space<vmem>>, vector<2x6xf32>
    %164 = arith.truncf %163 : vector<2x6xf32> to vector<2x6xbf16>
    %c512 = arith.constant 512 : index
    %c0_36 = arith.constant 0 : index
    %165 = vector.load %arg6[%c512, %c0_36] : memref<519x512xbf16, #tpu.memory_space<vmem>>, vector<6x512xbf16>
    %cst_37 = arith.constant dense<0.000000e+00> : vector<2x512xf32>
    %166 = tpu.matmul %164, %165, %cst_37 {dimension_numbers = #tpu.dot_dimension_numbers<[1], [0], [0], [1], [0, 0, 1, 1], [], []>} : vector<2x6xbf16>, vector<6x512xbf16>, vector<2x512xf32> -> vector<2x512xf32>
    %c518 = arith.constant 518 : index
    %c0_38 = arith.constant 0 : index
    %167 = vector.load %arg6[%c518, %c0_38] : memref<519x512xbf16, #tpu.memory_space<vmem>>, vector<1x512xbf16>
    %168 = arith.extf %167 : vector<1x512xbf16> to vector<1x512xf32>
    %169 = vector.broadcast %168 : vector<1x512xf32> to vector<2x512xf32>
    %170 = arith.addf %166, %169 : vector<2x512xf32>
    %171 = vector.extract_strided_slice %78 {offsets = [0, 0, 0], sizes = [2, 1, 32], strides = [1, 1, 1]} : vector<2x8x32xf32> to vector<2x1x32xf32>
    %172 = vector.shape_cast %171 : vector<2x1x32xf32> to vector<2x32xf32>
    %173 = arith.truncf %172 : vector<2x32xf32> to vector<2x32xbf16>
    %c0_39 = arith.constant 0 : index
    %c0_40 = arith.constant 0 : index
    %174 = vector.load %arg6[%c0_39, %c0_40] : memref<519x512xbf16, #tpu.memory_space<vmem>>, vector<32x512xbf16>
    %cst_41 = arith.constant dense<0.000000e+00> : vector<2x512xf32>
    %175 = tpu.matmul %173, %174, %cst_41 {dimension_numbers = #tpu.dot_dimension_numbers<[1], [0], [0], [1], [0, 0, 1, 1], [], []>} : vector<2x32xbf16>, vector<32x512xbf16>, vector<2x512xf32> -> vector<2x512xf32>
    %176 = arith.addf %170, %175 : vector<2x512xf32>
    %177 = vector.extract_strided_slice %162 {offsets = [0, 0, 0], sizes = [2, 1, 32], strides = [1, 1, 1]} : vector<2x8x32xf32> to vector<2x1x32xf32>
    %178 = vector.shape_cast %177 : vector<2x1x32xf32> to vector<2x32xf32>
    %179 = arith.truncf %178 : vector<2x32xf32> to vector<2x32xbf16>
    %c256 = arith.constant 256 : index
    %c0_42 = arith.constant 0 : index
    %180 = vector.load %arg6[%c256, %c0_42] : memref<519x512xbf16, #tpu.memory_space<vmem>>, vector<32x512xbf16>
    %cst_43 = arith.constant dense<0.000000e+00> : vector<2x512xf32>
    %181 = tpu.matmul %179, %180, %cst_43 {dimension_numbers = #tpu.dot_dimension_numbers<[1], [0], [0], [1], [0, 0, 1, 1], [], []>} : vector<2x32xbf16>, vector<32x512xbf16>, vector<2x512xf32> -> vector<2x512xf32>
    %182 = arith.addf %176, %181 : vector<2x512xf32>
    %183 = vector.extract_strided_slice %78 {offsets = [0, 1, 0], sizes = [2, 1, 32], strides = [1, 1, 1]} : vector<2x8x32xf32> to vector<2x1x32xf32>
    %184 = vector.shape_cast %183 : vector<2x1x32xf32> to vector<2x32xf32>
    %185 = arith.truncf %184 : vector<2x32xf32> to vector<2x32xbf16>
    %c32 = arith.constant 32 : index
    %c0_44 = arith.constant 0 : index
    %186 = vector.load %arg6[%c32, %c0_44] : memref<519x512xbf16, #tpu.memory_space<vmem>>, vector<32x512xbf16>
    %cst_45 = arith.constant dense<0.000000e+00> : vector<2x512xf32>
    %187 = tpu.matmul %185, %186, %cst_45 {dimension_numbers = #tpu.dot_dimension_numbers<[1], [0], [0], [1], [0, 0, 1, 1], [], []>} : vector<2x32xbf16>, vector<32x512xbf16>, vector<2x512xf32> -> vector<2x512xf32>
    %188 = arith.addf %182, %187 : vector<2x512xf32>
    %189 = vector.extract_strided_slice %162 {offsets = [0, 1, 0], sizes = [2, 1, 32], strides = [1, 1, 1]} : vector<2x8x32xf32> to vector<2x1x32xf32>
    %190 = vector.shape_cast %189 : vector<2x1x32xf32> to vector<2x32xf32>
    %191 = arith.truncf %190 : vector<2x32xf32> to vector<2x32xbf16>
    %c288 = arith.constant 288 : index
    %c0_46 = arith.constant 0 : index
    %192 = vector.load %arg6[%c288, %c0_46] : memref<519x512xbf16, #tpu.memory_space<vmem>>, vector<32x512xbf16>
    %cst_47 = arith.constant dense<0.000000e+00> : vector<2x512xf32>
    %193 = tpu.matmul %191, %192, %cst_47 {dimension_numbers = #tpu.dot_dimension_numbers<[1], [0], [0], [1], [0, 0, 1, 1], [], []>} : vector<2x32xbf16>, vector<32x512xbf16>, vector<2x512xf32> -> vector<2x512xf32>
    %194 = arith.addf %188, %193 : vector<2x512xf32>
    %195 = vector.extract_strided_slice %78 {offsets = [0, 2, 0], sizes = [2, 1, 32], strides = [1, 1, 1]} : vector<2x8x32xf32> to vector<2x1x32xf32>
    %196 = vector.shape_cast %195 : vector<2x1x32xf32> to vector<2x32xf32>
    %197 = arith.truncf %196 : vector<2x32xf32> to vector<2x32xbf16>
    %c64 = arith.constant 64 : index
    %c0_48 = arith.constant 0 : index
    %198 = vector.load %arg6[%c64, %c0_48] : memref<519x512xbf16, #tpu.memory_space<vmem>>, vector<32x512xbf16>
    %cst_49 = arith.constant dense<0.000000e+00> : vector<2x512xf32>
    %199 = tpu.matmul %197, %198, %cst_49 {dimension_numbers = #tpu.dot_dimension_numbers<[1], [0], [0], [1], [0, 0, 1, 1], [], []>} : vector<2x32xbf16>, vector<32x512xbf16>, vector<2x512xf32> -> vector<2x512xf32>
    %200 = arith.addf %194, %199 : vector<2x512xf32>
    %201 = vector.extract_strided_slice %162 {offsets = [0, 2, 0], sizes = [2, 1, 32], strides = [1, 1, 1]} : vector<2x8x32xf32> to vector<2x1x32xf32>
    %202 = vector.shape_cast %201 : vector<2x1x32xf32> to vector<2x32xf32>
    %203 = arith.truncf %202 : vector<2x32xf32> to vector<2x32xbf16>
    %c320 = arith.constant 320 : index
    %c0_50 = arith.constant 0 : index
    %204 = vector.load %arg6[%c320, %c0_50] : memref<519x512xbf16, #tpu.memory_space<vmem>>, vector<32x512xbf16>
    %cst_51 = arith.constant dense<0.000000e+00> : vector<2x512xf32>
    %205 = tpu.matmul %203, %204, %cst_51 {dimension_numbers = #tpu.dot_dimension_numbers<[1], [0], [0], [1], [0, 0, 1, 1], [], []>} : vector<2x32xbf16>, vector<32x512xbf16>, vector<2x512xf32> -> vector<2x512xf32>
    %206 = arith.addf %200, %205 : vector<2x512xf32>
    %207 = vector.extract_strided_slice %78 {offsets = [0, 3, 0], sizes = [2, 1, 32], strides = [1, 1, 1]} : vector<2x8x32xf32> to vector<2x1x32xf32>
    %208 = vector.shape_cast %207 : vector<2x1x32xf32> to vector<2x32xf32>
    %209 = arith.truncf %208 : vector<2x32xf32> to vector<2x32xbf16>
    %c96 = arith.constant 96 : index
    %c0_52 = arith.constant 0 : index
    %210 = vector.load %arg6[%c96, %c0_52] : memref<519x512xbf16, #tpu.memory_space<vmem>>, vector<32x512xbf16>
    %cst_53 = arith.constant dense<0.000000e+00> : vector<2x512xf32>
    %211 = tpu.matmul %209, %210, %cst_53 {dimension_numbers = #tpu.dot_dimension_numbers<[1], [0], [0], [1], [0, 0, 1, 1], [], []>} : vector<2x32xbf16>, vector<32x512xbf16>, vector<2x512xf32> -> vector<2x512xf32>
    %212 = arith.addf %206, %211 : vector<2x512xf32>
    %213 = vector.extract_strided_slice %162 {offsets = [0, 3, 0], sizes = [2, 1, 32], strides = [1, 1, 1]} : vector<2x8x32xf32> to vector<2x1x32xf32>
    %214 = vector.shape_cast %213 : vector<2x1x32xf32> to vector<2x32xf32>
    %215 = arith.truncf %214 : vector<2x32xf32> to vector<2x32xbf16>
    %c352 = arith.constant 352 : index
    %c0_54 = arith.constant 0 : index
    %216 = vector.load %arg6[%c352, %c0_54] : memref<519x512xbf16, #tpu.memory_space<vmem>>, vector<32x512xbf16>
    %cst_55 = arith.constant dense<0.000000e+00> : vector<2x512xf32>
    %217 = tpu.matmul %215, %216, %cst_55 {dimension_numbers = #tpu.dot_dimension_numbers<[1], [0], [0], [1], [0, 0, 1, 1], [], []>} : vector<2x32xbf16>, vector<32x512xbf16>, vector<2x512xf32> -> vector<2x512xf32>
    %218 = arith.addf %212, %217 : vector<2x512xf32>
    %219 = vector.extract_strided_slice %78 {offsets = [0, 4, 0], sizes = [2, 1, 32], strides = [1, 1, 1]} : vector<2x8x32xf32> to vector<2x1x32xf32>
    %220 = vector.shape_cast %219 : vector<2x1x32xf32> to vector<2x32xf32>
    %221 = arith.truncf %220 : vector<2x32xf32> to vector<2x32xbf16>
    %c128 = arith.constant 128 : index
    %c0_56 = arith.constant 0 : index
    %222 = vector.load %arg6[%c128, %c0_56] : memref<519x512xbf16, #tpu.memory_space<vmem>>, vector<32x512xbf16>
    %cst_57 = arith.constant dense<0.000000e+00> : vector<2x512xf32>
    %223 = tpu.matmul %221, %222, %cst_57 {dimension_numbers = #tpu.dot_dimension_numbers<[1], [0], [0], [1], [0, 0, 1, 1], [], []>} : vector<2x32xbf16>, vector<32x512xbf16>, vector<2x512xf32> -> vector<2x512xf32>
    %224 = arith.addf %218, %223 : vector<2x512xf32>
    %225 = vector.extract_strided_slice %162 {offsets = [0, 4, 0], sizes = [2, 1, 32], strides = [1, 1, 1]} : vector<2x8x32xf32> to vector<2x1x32xf32>
    %226 = vector.shape_cast %225 : vector<2x1x32xf32> to vector<2x32xf32>
    %227 = arith.truncf %226 : vector<2x32xf32> to vector<2x32xbf16>
    %c384 = arith.constant 384 : index
    %c0_58 = arith.constant 0 : index
    %228 = vector.load %arg6[%c384, %c0_58] : memref<519x512xbf16, #tpu.memory_space<vmem>>, vector<32x512xbf16>
    %cst_59 = arith.constant dense<0.000000e+00> : vector<2x512xf32>
    %229 = tpu.matmul %227, %228, %cst_59 {dimension_numbers = #tpu.dot_dimension_numbers<[1], [0], [0], [1], [0, 0, 1, 1], [], []>} : vector<2x32xbf16>, vector<32x512xbf16>, vector<2x512xf32> -> vector<2x512xf32>
    %230 = arith.addf %224, %229 : vector<2x512xf32>
    %231 = vector.extract_strided_slice %78 {offsets = [0, 5, 0], sizes = [2, 1, 32], strides = [1, 1, 1]} : vector<2x8x32xf32> to vector<2x1x32xf32>
    %232 = vector.shape_cast %231 : vector<2x1x32xf32> to vector<2x32xf32>
    %233 = arith.truncf %232 : vector<2x32xf32> to vector<2x32xbf16>
    %c160 = arith.constant 160 : index
    %c0_60 = arith.constant 0 : index
    %234 = vector.load %arg6[%c160, %c0_60] : memref<519x512xbf16, #tpu.memory_space<vmem>>, vector<32x512xbf16>
    %cst_61 = arith.constant dense<0.000000e+00> : vector<2x512xf32>
    %235 = tpu.matmul %233, %234, %cst_61 {dimension_numbers = #tpu.dot_dimension_numbers<[1], [0], [0], [1], [0, 0, 1, 1], [], []>} : vector<2x32xbf16>, vector<32x512xbf16>, vector<2x512xf32> -> vector<2x512xf32>
    %236 = arith.addf %230, %235 : vector<2x512xf32>
    %237 = vector.extract_strided_slice %162 {offsets = [0, 5, 0], sizes = [2, 1, 32], strides = [1, 1, 1]} : vector<2x8x32xf32> to vector<2x1x32xf32>
    %238 = vector.shape_cast %237 : vector<2x1x32xf32> to vector<2x32xf32>
    %239 = arith.truncf %238 : vector<2x32xf32> to vector<2x32xbf16>
    %c416 = arith.constant 416 : index
    %c0_62 = arith.constant 0 : index
    %240 = vector.load %arg6[%c416, %c0_62] : memref<519x512xbf16, #tpu.memory_space<vmem>>, vector<32x512xbf16>
    %cst_63 = arith.constant dense<0.000000e+00> : vector<2x512xf32>
    %241 = tpu.matmul %239, %240, %cst_63 {dimension_numbers = #tpu.dot_dimension_numbers<[1], [0], [0], [1], [0, 0, 1, 1], [], []>} : vector<2x32xbf16>, vector<32x512xbf16>, vector<2x512xf32> -> vector<2x512xf32>
    %242 = arith.addf %236, %241 : vector<2x512xf32>
    %243 = vector.extract_strided_slice %78 {offsets = [0, 6, 0], sizes = [2, 1, 32], strides = [1, 1, 1]} : vector<2x8x32xf32> to vector<2x1x32xf32>
    %244 = vector.shape_cast %243 : vector<2x1x32xf32> to vector<2x32xf32>
    %245 = arith.truncf %244 : vector<2x32xf32> to vector<2x32xbf16>
    %c192 = arith.constant 192 : index
    %c0_64 = arith.constant 0 : index
    %246 = vector.load %arg6[%c192, %c0_64] : memref<519x512xbf16, #tpu.memory_space<vmem>>, vector<32x512xbf16>
    %cst_65 = arith.constant dense<0.000000e+00> : vector<2x512xf32>
    %247 = tpu.matmul %245, %246, %cst_65 {dimension_numbers = #tpu.dot_dimension_numbers<[1], [0], [0], [1], [0, 0, 1, 1], [], []>} : vector<2x32xbf16>, vector<32x512xbf16>, vector<2x512xf32> -> vector<2x512xf32>
    %248 = arith.addf %242, %247 : vector<2x512xf32>
    %249 = vector.extract_strided_slice %162 {offsets = [0, 6, 0], sizes = [2, 1, 32], strides = [1, 1, 1]} : vector<2x8x32xf32> to vector<2x1x32xf32>
    %250 = vector.shape_cast %249 : vector<2x1x32xf32> to vector<2x32xf32>
    %251 = arith.truncf %250 : vector<2x32xf32> to vector<2x32xbf16>
    %c448 = arith.constant 448 : index
    %c0_66 = arith.constant 0 : index
    %252 = vector.load %arg6[%c448, %c0_66] : memref<519x512xbf16, #tpu.memory_space<vmem>>, vector<32x512xbf16>
    %cst_67 = arith.constant dense<0.000000e+00> : vector<2x512xf32>
    %253 = tpu.matmul %251, %252, %cst_67 {dimension_numbers = #tpu.dot_dimension_numbers<[1], [0], [0], [1], [0, 0, 1, 1], [], []>} : vector<2x32xbf16>, vector<32x512xbf16>, vector<2x512xf32> -> vector<2x512xf32>
    %254 = arith.addf %248, %253 : vector<2x512xf32>
    %255 = vector.extract_strided_slice %78 {offsets = [0, 7, 0], sizes = [2, 1, 32], strides = [1, 1, 1]} : vector<2x8x32xf32> to vector<2x1x32xf32>
    %256 = vector.shape_cast %255 : vector<2x1x32xf32> to vector<2x32xf32>
    %257 = arith.truncf %256 : vector<2x32xf32> to vector<2x32xbf16>
    %c224 = arith.constant 224 : index
    %c0_68 = arith.constant 0 : index
    %258 = vector.load %arg6[%c224, %c0_68] : memref<519x512xbf16, #tpu.memory_space<vmem>>, vector<32x512xbf16>
    %cst_69 = arith.constant dense<0.000000e+00> : vector<2x512xf32>
    %259 = tpu.matmul %257, %258, %cst_69 {dimension_numbers = #tpu.dot_dimension_numbers<[1], [0], [0], [1], [0, 0, 1, 1], [], []>} : vector<2x32xbf16>, vector<32x512xbf16>, vector<2x512xf32> -> vector<2x512xf32>
    %260 = arith.addf %254, %259 : vector<2x512xf32>
    %261 = vector.extract_strided_slice %162 {offsets = [0, 7, 0], sizes = [2, 1, 32], strides = [1, 1, 1]} : vector<2x8x32xf32> to vector<2x1x32xf32>
    %262 = vector.shape_cast %261 : vector<2x1x32xf32> to vector<2x32xf32>
    %263 = arith.truncf %262 : vector<2x32xf32> to vector<2x32xbf16>
    %c480 = arith.constant 480 : index
    %c0_70 = arith.constant 0 : index
    %264 = vector.load %arg6[%c480, %c0_70] : memref<519x512xbf16, #tpu.memory_space<vmem>>, vector<32x512xbf16>
    %cst_71 = arith.constant dense<0.000000e+00> : vector<2x512xf32>
    %265 = tpu.matmul %263, %264, %cst_71 {dimension_numbers = #tpu.dot_dimension_numbers<[1], [0], [0], [1], [0, 0, 1, 1], [], []>} : vector<2x32xbf16>, vector<32x512xbf16>, vector<2x512xf32> -> vector<2x512xf32>
    %266 = arith.addf %260, %265 : vector<2x512xf32>
    %cst_72 = arith.constant 0.000000e+00 : f32
    %267 = vector.broadcast %cst_72 : f32 to vector<2x512xf32>
    %268 = arith.cmpf ogt, %266, %267 : vector<2x512xf32>
    %cst_73 = arith.constant 0.00999999977 : f32
    %269 = vector.broadcast %cst_73 : f32 to vector<2x512xf32>
    %270 = arith.mulf %269, %266 : vector<2x512xf32>
    %271 = arith.select %268, %266, %270 : vector<2x512xi1>, vector<2x512xf32>
    %272 = arith.truncf %271 : vector<2x512xf32> to vector<2x512xbf16>
    %c0_74 = arith.constant 0 : index
    %c0_75 = arith.constant 0 : index
    %273 = vector.load %arg7[%c0_74, %c0_75] : memref<513x256xbf16, #tpu.memory_space<vmem>>, vector<512x256xbf16>
    %cst_76 = arith.constant dense<0.000000e+00> : vector<2x256xf32>
    %274 = tpu.matmul %272, %273, %cst_76 {dimension_numbers = #tpu.dot_dimension_numbers<[1], [0], [0], [1], [0, 0, 1, 1], [], []>} : vector<2x512xbf16>, vector<512x256xbf16>, vector<2x256xf32> -> vector<2x256xf32>
    %c512_77 = arith.constant 512 : index
    %c0_78 = arith.constant 0 : index
    %275 = vector.load %arg7[%c512_77, %c0_78] : memref<513x256xbf16, #tpu.memory_space<vmem>>, vector<1x256xbf16>
    %276 = arith.extf %275 : vector<1x256xbf16> to vector<1x256xf32>
    %277 = vector.broadcast %276 : vector<1x256xf32> to vector<2x256xf32>
    %278 = arith.addf %274, %277 : vector<2x256xf32>
    %cst_79 = arith.constant 0.000000e+00 : f32
    %279 = vector.broadcast %cst_79 : f32 to vector<2x256xf32>
    %280 = arith.cmpf ogt, %278, %279 : vector<2x256xf32>
    %cst_80 = arith.constant 0.00999999977 : f32
    %281 = vector.broadcast %cst_80 : f32 to vector<2x256xf32>
    %282 = arith.mulf %281, %278 : vector<2x256xf32>
    %283 = arith.select %280, %278, %282 : vector<2x256xi1>, vector<2x256xf32>
    %284 = arith.truncf %283 : vector<2x256xf32> to vector<2x256xbf16>
    %c0_81 = arith.constant 0 : index
    %c0_82 = arith.constant 0 : index
    %285 = vector.load %arg8[%c0_81, %c0_82] : memref<257x128xbf16, #tpu.memory_space<vmem>>, vector<256x128xbf16>
    %cst_83 = arith.constant dense<0.000000e+00> : vector<2x128xf32>
    %286 = tpu.matmul %284, %285, %cst_83 {dimension_numbers = #tpu.dot_dimension_numbers<[1], [0], [0], [1], [0, 0, 1, 1], [], []>} : vector<2x256xbf16>, vector<256x128xbf16>, vector<2x128xf32> -> vector<2x128xf32>
    %c256_84 = arith.constant 256 : index
    %c0_85 = arith.constant 0 : index
    %287 = vector.load %arg8[%c256_84, %c0_85] : memref<257x128xbf16, #tpu.memory_space<vmem>>, vector<1x128xbf16>
    %288 = arith.extf %287 : vector<1x128xbf16> to vector<1x128xf32>
    %289 = vector.broadcast %288 : vector<1x128xf32> to vector<2x128xf32>
    %290 = arith.addf %286, %289 : vector<2x128xf32>
    %cst_86 = arith.constant 0.000000e+00 : f32
    %291 = vector.broadcast %cst_86 : f32 to vector<2x128xf32>
    %292 = arith.maximumf %290, %291 : vector<2x128xf32>
    %c0_87 = arith.constant 0 : index
    %c0_88 = arith.constant 0 : index
    %293 = vector.load %arg9[%c0_87, %c0_88] : memref<2x128xf32, #tpu.memory_space<vmem>>, vector<2x128xf32>
    tpu.vector_store %arg9[%c0_87, %c0_88], %292 {strides = array<i32>} : memref<2x128xf32, #tpu.memory_space<vmem>>, vector<2x128xf32>,
    return
  }
  func.func @transform_0(%arg0: i32) -> (i32, i32) {
    %c0_i32 = arith.constant 0 : i32
    %c0_i32_0 = arith.constant 0 : i32
    return %c0_i32, %arg0 : i32, i32
  }
  func.func @transform_1(%arg0: i32) -> (i32, i32) {
    %c0_i32 = arith.constant 0 : i32
    %c0_i32_0 = arith.constant 0 : i32
    return %arg0, %c0_i32 : i32, i32
  }
  func.func @transform_2(%arg0: i32) -> (i32, i32) {
    %c0_i32 = arith.constant 0 : i32
    %c0_i32_0 = arith.constant 0 : i32
    %c0_i32_1 = arith.constant 0 : i32
    return %c0_i32, %c0_i32_0 : i32, i32
  }
  func.func @transform_3(%arg0: i32) -> (i32, i32) {
    %c0_i32 = arith.constant 0 : i32
    %c0_i32_0 = arith.constant 0 : i32
    %c0_i32_1 = arith.constant 0 : i32
    return %c0_i32, %c0_i32_0 : i32, i32
  }
  func.func @transform_4(%arg0: i32) -> (i32, i32) {
    %c0_i32 = arith.constant 0 : i32
    %c0_i32_0 = arith.constant 0 : i32
    %c0_i32_1 = arith.constant 0 : i32
    return %c0_i32, %c0_i32_0 : i32, i32
  }
  func.func @transform_5(%arg0: i32) -> (i32, i32) {
    %c0_i32 = arith.constant 0 : i32
    %c0_i32_0 = arith.constant 0 : i32
    %c0_i32_1 = arith.constant 0 : i32
    return %c0_i32, %c0_i32_0 : i32, i32
  }
  func.func @transform_6(%arg0: i32) -> (i32, i32) {
    %c0_i32 = arith.constant 0 : i32
    %c0_i32_0 = arith.constant 0 : i32
    %c0_i32_1 = arith.constant 0 : i32
    return %c0_i32, %c0_i32_0 : i32, i32
  }
  func.func @transform_7(%arg0: i32) -> (i32, i32) {
    %c0_i32 = arith.constant 0 : i32
    %c0_i32_0 = arith.constant 0 : i32
    %c0_i32_1 = arith.constant 0 : i32
    return %c0_i32, %c0_i32_0 : i32, i32
  }
  func.func @transform_8(%arg0: i32) -> (i32, i32) {
    %c0_i32 = arith.constant 0 : i32
    %c0_i32_0 = arith.constant 0 : i32
    return %arg0, %c0_i32 : i32, i32
  }
}

</mosaic_0001>

<bundles_post_ra>
// kernel: forward.1
= control target key start
LH: loop header
LB: loop body
LE: loop exit
PB: predicated region body
PF: predicated region fallthrough
CT: control target
= control target key end

     0   :  { %v5486_v0 = vmov 0.0   ;;  %vm5487_vm0 = vmmov 0   ;;  %v5488_v2 = vmov 96   ;;  %vm105_vm1 = vcmask 785408   ;;  %s5491_s20 = smov 1   ;;  %s5493_s30 = smov 96   ;;  %s6598_s0 = inlined_call_operand.vmem [shape: bf16[96,64], index: 0, kind: input, shape index: {}]   ;;  %s6599_s2 = inlined_call_operand.vmem [shape: bf16[8,97], index: 2, kind: input, shape index: {}]   ;;  %s6600_s3 = inlined_call_operand.vmem [shape: bf16[24,25], index: 3, kind: input, shape index: {}]   ;;  %s6601_s4 = inlined_call_operand.vmem [shape: bf16[99,32], index: 4, kind: input, shape index: {}]   ;;  %s6602_s5 = inlined_call_operand.vmem [shape: bf16[519,512], index: 5, kind: input, shape index: {}]   ;;  %s6603_s1 = inlined_call_operand.vmem [shape: f32[2,6], index: 1, kind: input, shape index: {}]   ;;  %s6604_s6 = inlined_call_operand.vmem [shape: bf16[513,256], index: 6, kind: input, shape index: {}]   ;;  %s6605_s7 = inlined_call_operand.vmem [shape: bf16[257,128], index: 7, kind: input, shape index: {}]   ;;  %s6606_s8 = inlined_call_operand.vmem [shape: f32[2,128], index: 8, kind: output, shape index: {}]  }
   0x1   :  { %4822 = vmatprep.subr.bf16.mxu1 %v5486_v0  ;;  %v5131_v1 = vld [vmem:[%s6598_s0] sm:$0xff]   ;;  %4834 = vmatprep.mubr.msk.bf16.mxu1 %vm5487_vm0, %v5486_v0  ;;  %v5132_v3 = vld [vmem:[%s6598_s0 + $0x8] sm:$0xff]   ;;  %v5133_v4 = vld [vmem:[%s6598_s0 + $0x10] sm:$0xff]   ;;  %vm206_vm2 = vcmask 195584   ;;  %v5489_v19 = vmov 24   ;;  %v163_v24 = vlaneseq  ;;  %vm161_vm4 = vcmask 515072  }
   0x2   :  { %5118 = vset.pattern.permute.xlu0 %v5488_v2  ;;  %4862 = vmatprep.subr.bf16.mxu0 %v5486_v0  ;;  %v30_v5 = vld [vmem:[%s6599_s2] sm:$0xf]  ;;  %v5134_v7 = vld [vmem:[%s6598_s0 + $0x18] sm:$0xff]   ;;  %v5136_v9 = vld [vmem:[%s6598_s0 + $0x28] sm:$0xff]   ;;  %vm156_vm5 = vcmask 7168   ;;  %vm5492_vm8 = vmmov 1  }
   0x3   :  { %4823 = vmatpush3.bf16.msra.mxu1 %v5131_v1  ;;  %4866 = vmatprep.mubr.msk.bf16.mxu0 %vm5487_vm0, %v5486_v0  ;;  %v31_v6 = vunpack.c.l.bf16 %v30_v5  ;;  %v5135_v8 = vld [vmem:[%s6598_s0 + $0x20] sm:$0xff]   ;;  %s5490_s0 = smov 127   ;;  %v34_v22 = vld [vmem:[%s6600_s3 + $0x8] sm:$0xf]  ;;  %v164_v25 = vand.u32 127, %v163_v24  ;;  %vm213_vm10 = vcmask 1043456  }
   0x4   :  { %4824 = vmatprep.subr.bf16.mxu1 %v5486_v0  ;;  %v32_v12 = vld [vmem:[%s6600_s3] sm:$0xff]   ;;  %5119 = vset.pattern.permute.xlu1 %v5489_v19  ;;  %v37_v23 = vunpack.c.l.bf16 %v34_v22  ;;  %v4467_v35 = vcombine.low %v34_v22, %v34_v22  ;;  %v5140_v37 = vld [vmem:[%s6601_s4 + $0x8] sm:$0xff]   ;;  %vm297_vm11 = vcmask 261120   ;;  %v5141_v51 = vld [vmem:[%s6601_s4 + $0x10] sm:$0xff]   ;;  %v5634_v58 = vshrl.u32 %v163_v24, 7  ;;  %s5495_s15 = smov 112  }
   0x5   :  { %66 = vperm.xlu0 %5118, %v31_v6   ;;  %v36_v20 = vunpack.c.h.bf16 %v32_v12  ;;  %v35_v21 = vunpack.c.l.bf16 %v32_v12  ;;  %v169_v26 = vand.u32 31, %v164_v25  ;;  %v5139_v36 = vld [vmem:[%s6601_s4] sm:$0xff]   ;;  %v5144_v39 = vld [vmem:[%s6601_s4 + $0x28] sm:$0xff]   ;;  %v5143_v54 = vld [vmem:[%s6601_s4 + $0x18] sm:$0xff]   ;;  %vm470_vm12 = vcmask 64512   ;;  %s5496_s16 = smov 104  }
   0x6   :  { %v5142_v38 = vld [vmem:[%s6601_s4 + $0x20] sm:$0xff]   ;;  %v50_v59 = vld [vmem:[%s6601_s4 + $0x30] sm:$0x3]  ;;  %v345_v62 = vsub.s32 1, %v5634_v58  ;;  %v5643_v2 = vsub.s32 0, %v5634_v58  ;;  %s5494_s4 = smov 120  }
   0x7   :  { %4825 = vmatpush3.bf16.msra.mxu1 %v5132_v3  ;;  %vm4747_vm6 = vcmp.ne.s32.totalorder %v169_v26, 0  ;;  %vm179_vm7 = vcmp.eq.s32.totalorder %v169_v26, 31  ;;  %4863 = vmatpush3.bf16.msra.mxu0 %v5142_v38  ;;  %v5640_v1 = vunpack.c.l.bf16 %v50_v59  ;;  %vm1418_vm13 = vcmask 1042432   ;;  %s5498_s13 = smov 8   ;;  %s5499_s14 = smov 16  }
   0x8   :  { %4826 = vmatprep.subr.bf16.mxu1 %v5486_v0  ;;  %vm4469_vm9 = vmpackc.low %vm5492_vm8, %vm4747_vm6  ;;  %4864 = vmatprep.subr.bf16.mxu0 %v5486_v0  ;;  %vm1414_vm14 = vcmask 48128   ;;  %vm1528_vm15 = vcmask 1041409   ;;  %s5500_s26 = smov 24  }
   0x9   :  { %5120 = vset.pattern.permute.xlu0 %v5489_v19 }
   0xb   :  { %4827 = vmatpush3.bf16.msra.mxu1 %v5133_v4  ;;  %4865 = vmatpush3.bf16.msra.mxu0 %v5144_v39  ;;  %v346_v4 = vrot.slane %v5640_v1, %v345_v62 }
   0xc   :  { %4828 = vmatprep.subr.bf16.mxu1 %v5486_v0  ;;  %4876 = vmatprep.subr.bf16.mxu0 %v5486_v0 }
   0xf   :  { %4829 = vmatpush3.bf16.msra.mxu1 %v5134_v7 }
  0x10   :  { %4830 = vmatprep.subr.bf16.mxu1 %v5486_v0 }
  0x13   :  { %4831 = vmatpush3.bf16.msra.mxu1 %v5135_v8 }
  0x14   :  { %4832 = vmatprep.subr.bf16.mxu1 %v5486_v0 }
  0x17   :  { %4833 = vmatpush3.bf16.msra.mxu1 %v5136_v9 }
  0x1a   :  { %4835 = vmatmul.mubr.msk.bf16.vlgmr.msra.gmra.mrb[0].mxu1 %vm105_vm1, %v30_v5  ;;  %v284_v5 = vrot.slane %v5640_v1, %v5643_v2 }
  0x1b   :  { %4842 = vmatprep.mubr.msk.bf16.mxu1 %vm206_vm2, %v32_v12 }
  0x84   :  { %v67_v10 = vpop.permute.xlu0 %66 }
  0xed   :  { %v143_v11 = vpop.f32.mrb[0].mxu1 }
  0xee   :  { %v144_v13 = vadd.f32 %v143_v11, %v67_v10  ;;  %v4836_v14 = vpop.f32.mrb[1].mxu1 }
  0xef   :  { %v146_v15 = vpop.f32.mrb[2].mxu1 }
  0xf0   :  { %vm149_vm3 = vcmp.gt.f32.partialorder %v144_v13, 0.0  ;;  %v150_v16 = vmul.f32 0.01, %v144_v13  ;;  %v4837_v17 = vpop.f32.mrb[3].mxu1 }
  0xf2   :  { %v5582_v18 = vsel %vm149_vm3, %v144_v13, %v150_v16 }
  0xf3   :  { %158 = vrot.lane.b32.xlu1 %v5582_v18, %s5490_s0  ;;  %153 = vrot.lane.b32.xlu0 %v5582_v18, %s5491_s20 }
  0xf7   :  { %190 = vperm.xlu0 %5120, %v36_v20   ;;  %185 = vperm.xlu1 %5119, %v35_v21  }
  0xfb   :  { %195 = vperm.xlu0 %5120, %v37_v23  }
 0x165   :  { %v159_v27 = vpop.permute.xlu1 %158  ;;  %v154_v28 = vpop.permute.xlu0 %153 }
 0x166   :  { %v162_v29 = vsel %vm161_vm4, %v159_v27, 0.0  ;;  %v157_v30 = vsel %vm156_vm5, 0.0, %v154_v28 }
 0x167   :  { %v180_v31 = vsel %vm179_vm7, 0.0, %v162_v29  ;;  %v4470_v32 = vpack.c.bf16 %v5582_v18, %v157_v30 }
 0x168   :  { %v182_v33 = vpack.c.bf16 %v180_v31, %v180_v31 }
 0x169   :  { %4838 = vmatprep.subr.msk.bf16.mxu1 %vm4469_vm9, %v4470_v32 }
 0x16a   :  { %4839 = vmatpush3.bf16.msk.msra.mxu1 %vm4469_vm9, %v4470_v32  ;;  %v215_v34 = vsel %vm213_vm10, %v182_v33, 0 }
 0x16b   :  { %5102 = vmatprep.subr.msk.bf16.mxu1 %vm213_vm10, %v182_v33 }
 0x16e   :  { %4841 = vmatpush3.bf16.msra.mxu1 %v215_v34 }
 0x16f   :  { %4846 = vmatprep.subr.bf16.mxu1 %v5486_v0 }
 0x171   :  { %4843 = vmatmul.mubr.msk.bf16.vlgmr.msra.gmra.mrb[4].mxu1 %vm206_vm2, %v4467_v35 }
 0x172   :  { %4850 = vmatprep.mubr.msk.bf16.mxu1 %vm5487_vm0, %v5486_v0  ;;  %4847 = vmatpush3.bf16.msra.mxu1 %v5139_v36  ;;  %v406_v36 = vsub.s32 2, %v5634_v58 }
 0x173   :  { %4848 = vmatprep.subr.bf16.mxu1 %v5486_v0 }
 0x176   :  { %4849 = vmatpush3.bf16.msra.mxu1 %v5140_v37  ;;  %v186_v40 = vpop.permute.xlu1 %185  ;;  %v191_v42 = vpop.permute.xlu0 %190 }
 0x177   :  { %4854 = vmatprep.subr.bf16.mxu1 %v5486_v0 }
 0x17a   :  { %v196_v48 = vpop.permute.xlu0 %195 }
 0x244   :  { %v4844_v41 = vpop.f32.mrb[4].mxu1 }
 0x245   :  { %v251_v43 = vpop.f32.mrb[5].mxu1  ;;  %v260_v49 = vadd.f32 %v4844_v41, %v196_v48 }
 0x246   :  { %v252_v44 = vadd.f32 %v251_v43, %v186_v40  ;;  %v4845_v45 = vpop.f32.mrb[6].mxu1  ;;  %v407_v40 = vrot.slane %v5640_v1, %v406_v36 }
 0x247   :  { %v254_v46 = vpop.f32.mrb[7].mxu1 }
 0x248   :  { %266 = vrot.lane.b32.xlu1 %v252_v44, %s5493_s30  ;;  %v255_v47 = vadd.f32 %v254_v46, %v191_v42 }
 0x24c   :  { %270 = vrot.lane.b32.xlu1 %v255_v47, %s5493_s30 }
 0x250   :  { %274 = vrot.lane.b32.xlu1 %v260_v49, %s5493_s30 }
 0x2ba   :  { %v267_v50 = vpop.permute.xlu1 %266 }
 0x2bb   :  { %v280_v52 = vpack.c.bf16 %v267_v50, %v252_v44 }
 0x2bd   :  { %4851 = vmatmul.mubr.msk.bf16.vlgmr.msra.gmra.mrb[8].mxu1 %vm297_vm11, %v280_v52 }
 0x2be   :  { %4855 = vmatpush3.bf16.msra.mxu1 %v5141_v51  ;;  %v271_v53 = vpop.permute.xlu1 %270  ;;  %4858 = vmatprep.mubr.msk.bf16.mxu1 %vm5487_vm0, %v5486_v0 }
 0x2bf   :  { %4856 = vmatprep.subr.bf16.mxu1 %v5486_v0  ;;  %v342_v56 = vpack.c.bf16 %v271_v53, %v255_v47 }
 0x2c2   :  { %4857 = vmatpush3.bf16.msra.mxu1 %v5143_v54  ;;  %v275_v55 = vpop.permute.xlu1 %274 }
 0x2c3   :  { %v403_v57 = vpack.c.bf16 %v275_v55, %v260_v49  ;;  %4870 = vmatprep.subr.bf16.mxu1 %v5486_v0 }
 0x2c5   :  { %4859 = vmatmul.mubr.msk.bf16.vlgmr.msra.gmra.mrb[12].mxu1 %vm297_vm11, %v342_v56  ;;  %4867 = vmatmul.mubr.msk.bf16.vlgmr.msra.gmra.mrb[0].mxu0 %vm297_vm11, %v403_v57 }
 0x2c6   :  { %4872 = vmatprep.mubr.msk.bf16.mxu1 %vm5487_vm0, %v5486_v0  ;;  %4878 = vmatprep.mubr.msk.bf16.mxu0 %vm5487_vm0, %v5486_v0 }
 0x390   :  { %v335_v60 = vpop.f32.mrb[8].mxu1 }
 0x391   :  { %v4852_v61 = vpop.f32.mrb[9].mxu1  ;;  %v336_v14 = vadd.f32 %v335_v60, %v284_v5 }
 0x392   :  { %v338_v63 = vpop.f32.mrb[10].mxu1 }
 0x393   :  { %v4853_v3 = vpop.f32.mrb[11].mxu1  ;;  %v339_v8 = vadd.f32 %v338_v63, %v284_v5  ;;  %v464_v23 = vmul.f32 0.35355338, %v336_v14 }
 0x395   :  { %v465_v20 = vmul.f32 0.35355338, %v339_v8  ;;  %v466_v26 = vpack.c.bf16 %v464_v23, %v464_v23 }
 0x397   :  { %v467_v25 = vpack.c.bf16 %v465_v20, %v465_v20 }
 0x398   :  { %v396_v6 = vpop.f32.mrb[12].mxu1  ;;  %v5648_v7 = vpop.f32.mrb[0].mxu0 }
 0x399   :  { %v397_v9 = vadd.f32 %v396_v6, %v346_v4  ;;  %v4860_v10 = vpop.f32.mrb[13].mxu1  ;;  %v4868_v11 = vpop.f32.mrb[1].mxu0  ;;  %v458_v44 = vadd.f32 %v5648_v7, %v407_v40 }
 0x39a   :  { %v399_v12 = vpop.f32.mrb[14].mxu1  ;;  %v5650_v13 = vpop.f32.mrb[2].mxu0 }
 0x39b   :  { %v468_v15 = vpack.c.bf16 %v397_v9, %v397_v9  ;;  %v400_v16 = vadd.f32 %v399_v12, %v346_v4  ;;  %v4861_v17 = vpop.f32.mrb[15].mxu1  ;;  %v4869_v19 = vpop.f32.mrb[3].mxu0  ;;  %v461_v45 = vadd.f32 %v5650_v13, %v407_v40  ;;  %v5702_v47 = vpack.c.bf16 %v458_v44, %v458_v44 }
 0x39d   :  { %v469_v21 = vpack.c.bf16 %v400_v16, %v400_v16  ;;  %567 = vrot.lane.b32.xlu1 %v468_v15, %s5494_s4  ;;  %v475_v22 = vsel %vm470_vm12, %v468_v15, 0  ;;  %v5704_v48 = vpack.c.bf16 %v461_v45, %v461_v45  ;;  %v969_v51 = vsel %vm213_vm10, %v5702_v47, 0 }
 0x39e   :  { %4871 = vmatpush3.bf16.xpose.msra.mxu1 %v475_v22 }
 0x39f   :  { %619 = vrot.lane.b32.xlu0 %v469_v21, %s5494_s4  ;;  %v521_v24 = vsel %vm470_vm12, %v469_v21, 0  ;;  %4882 = vmatprep.subr.bf16.mxu1 %v5486_v0  ;;  %v1015_v52 = vsel %vm213_vm10, %v5704_v48, 0 }
 0x3a0   :  { %4877 = vmatpush3.bf16.xpose.msra.mxu0 %v521_v24 }
 0x3a1   :  { %719 = vrot.lane.b32.xlu1 %v469_v21, %s5495_s15  ;;  %4888 = vmatprep.subr.bf16.mxu0 %v5486_v0 }
 0x3a3   :  { %616 = vrot.lane.b32.xlu0 %v467_v25, %s5494_s4 }
 0x3a5   :  { %4873 = vmatmul.mubr.msk.bf16.vlgmr.msra.gmra.mrb[16].mxu1 %vm470_vm12, %v466_v26  ;;  %669 = vrot.lane.b32.xlu1 %v468_v15, %s5495_s15 }
 0x3a6   :  { %4884 = vmatprep.mubr.msk.bf16.mxu1 %vm5487_vm0, %v5486_v0 }
 0x3a7   :  { %564 = vrot.lane.b32.xlu0 %v466_v26, %s5494_s4  ;;  %4879 = vmatmul.mubr.msk.bf16.vlgmr.msra.gmra.mrb[4].mxu0 %vm470_vm12, %v467_v25 }
 0x3a8   :  { %4890 = vmatprep.mubr.msk.bf16.mxu0 %vm5487_vm0, %v5486_v0 }
 0x3a9   :  { %819 = vrot.lane.b32.xlu1 %v469_v21, %s5496_s16 }
 0x3ab   :  { %717 = vrot.lane.b32.xlu0 %v467_v25, %s5495_s15 }
 0x3ad   :  { %769 = vrot.lane.b32.xlu1 %v468_v15, %s5496_s16 }
 0x3af   :  { %667 = vrot.lane.b32.xlu0 %v466_v26, %s5495_s15 }
 0x3b1   :  { %767 = vrot.lane.b32.xlu1 %v466_v26, %s5496_s16 }
 0x3b3   :  { %817 = vrot.lane.b32.xlu0 %v467_v25, %s5496_s16 }
 0x40f   :  { %v568_v27 = vpop.permute.xlu1 %567 }
 0x410   :  { %v573_v28 = vsel %vm470_vm12, %v568_v27, 0 }
 0x411   :  { %v620_v29 = vpop.permute.xlu0 %619  ;;  %4883 = vmatpush3.bf16.xpose.msra.mxu1 %v573_v28 }
 0x412   :  { %v625_v30 = vsel %vm470_vm12, %v620_v29, 0  ;;  %4894 = vmatprep.subr.bf16.mxu1 %v5486_v0 }
 0x413   :  { %4889 = vmatpush3.bf16.xpose.msra.mxu0 %v625_v30  ;;  %v720_v31 = vpop.permute.xlu1 %719 }
 0x414   :  { %4900 = vmatprep.subr.bf16.mxu0 %v5486_v0  ;;  %v725_v37 = vsel %vm470_vm12, %v720_v31, 0 }
 0x415   :  { %v617_v32 = vpop.permute.xlu0 %616 }
 0x417   :  { %v670_v33 = vpop.permute.xlu1 %669 }
 0x418   :  { %v675_v34 = vsel %vm470_vm12, %v670_v33, 0 }
 0x419   :  { %v565_v35 = vpop.permute.xlu0 %564 }
 0x41a   :  { %4885 = vmatmul.mubr.msk.bf16.vlgmr.msra.gmra.mrb[20].mxu1 %vm470_vm12, %v565_v35  ;;  %4891 = vmatmul.mubr.msk.bf16.vlgmr.msra.gmra.mrb[8].mxu0 %vm470_vm12, %v617_v32 }
 0x41b   :  { %4895 = vmatpush3.bf16.xpose.msra.mxu1 %v675_v34  ;;  %4901 = vmatpush3.bf16.xpose.msra.mxu0 %v725_v37  ;;  %v820_v38 = vpop.permute.xlu1 %819 }
 0x41c   :  { %4896 = vmatprep.mubr.msk.bf16.mxu1 %vm5487_vm0, %v5486_v0  ;;  %4902 = vmatprep.mubr.msk.bf16.mxu0 %vm5487_vm0, %v5486_v0  ;;  %v825_v46 = vsel %vm470_vm12, %v820_v38, 0 }
 0x41d   :  { %v718_v39 = vpop.permute.xlu0 %717  ;;  %4906 = vmatprep.subr.bf16.mxu1 %v5486_v0  ;;  %4912 = vmatprep.subr.bf16.mxu0 %v5486_v0 }
 0x41f   :  { %v770_v41 = vpop.permute.xlu1 %769 }
 0x420   :  { %v775_v42 = vsel %vm470_vm12, %v770_v41, 0 }
 0x421   :  { %v668_v43 = vpop.permute.xlu0 %667 }
 0x422   :  { %4897 = vmatmul.mubr.msk.bf16.vlgmr.msra.gmra.mrb[24].mxu1 %vm470_vm12, %v668_v43  ;;  %4903 = vmatmul.mubr.msk.bf16.vlgmr.msra.gmra.mrb[12].mxu0 %vm470_vm12, %v718_v39 }
 0x423   :  { %4907 = vmatpush3.bf16.xpose.msra.mxu1 %v775_v42  ;;  %4913 = vmatpush3.bf16.xpose.msra.mxu0 %v825_v46  ;;  %v768_v49 = vpop.permute.xlu1 %767 }
 0x424   :  { %4908 = vmatprep.mubr.msk.bf16.mxu1 %vm5487_vm0, %v5486_v0  ;;  %4914 = vmatprep.mubr.msk.bf16.mxu0 %vm5487_vm0, %v5486_v0 }
 0x425   :  { %4918 = vmatprep.subr.bf16.mxu1 %v5486_v0  ;;  %4924 = vmatprep.subr.bf16.mxu0 %v5486_v0  ;;  %v818_v50 = vpop.permute.xlu0 %817 }
 0x42a   :  { %4909 = vmatmul.mubr.msk.bf16.vlgmr.msra.gmra.mrb[28].mxu1 %vm470_vm12, %v768_v49  ;;  %4915 = vmatmul.mubr.msk.bf16.vlgmr.msra.gmra.mrb[16].mxu0 %vm470_vm12, %v818_v50 }
 0x42b   :  { %4919 = vmatpush3.bf16.msra.mxu1 %v969_v51  ;;  %4925 = vmatpush3.bf16.msra.mxu0 %v1015_v52 }
 0x42c   :  { %4920 = vmatprep.mubr.msk.bf16.mxu1 %vm5487_vm0, %v5486_v0  ;;  %4930 = vmatprep.subr.bf16.mxu1 %v5486_v0 }
 0x42d   :  { %4926 = vmatprep.mubr.msk.bf16.mxu0 %vm5487_vm0, %v5486_v0  ;;  %4936 = vmatprep.subr.bf16.mxu0 %v5486_v0 }
 0x478   :  { %v511_v53 = vpop.f32.mrb[16].mxu1 }
 0x479   :  { %v4874_v54 = vpop.f32.mrb[17].mxu1  ;;  %v867_v55 = vsel %vm470_vm12, %v511_v53, -inf }
 0x47a   :  { %868 = vmax.xlane.f32.xlu1 %v867_v55  ;;  %v514_v56 = vpop.f32.mrb[18].mxu1  ;;  %v557_v57 = vpop.f32.mrb[4].mxu0 }
 0x47b   :  { %v4875_v59 = vpop.f32.mrb[19].mxu1  ;;  %v4880_v60 = vpop.f32.mrb[5].mxu0  ;;  %v870_v61 = vsel %vm470_vm12, %v557_v57, -inf }
 0x47c   :  { %871 = vmax.xlane.f32.xlu0 %v870_v61  ;;  %v560_v62 = vpop.f32.mrb[6].mxu0 }
 0x47d   :  { %v4881_v63 = vpop.f32.mrb[7].mxu0 }
 0x4ed   :  { %v609_v1 = vpop.f32.mrb[20].mxu1  ;;  %v661_v3 = vpop.f32.mrb[8].mxu0 }
 0x4ee   :  { %v4886_v4 = vpop.f32.mrb[21].mxu1  ;;  %v4892_v5 = vpop.f32.mrb[9].mxu0  ;;  %v876_v6 = vsel %vm470_vm12, %v661_v3, -inf  ;;  %v873_v11 = vsel %vm470_vm12, %v609_v1, -inf }
 0x4ef   :  { %877 = vmax.xlane.f32.xlu0 %v876_v6  ;;  %v612_v7 = vpop.f32.mrb[22].mxu1  ;;  %v664_v8 = vpop.f32.mrb[10].mxu0 }
 0x4f0   :  { %v4887_v9 = vpop.f32.mrb[23].mxu1  ;;  %v4893_v10 = vpop.f32.mrb[11].mxu0 }
 0x4f3   :  { %874 = vmax.xlane.f32.xlu0 %v873_v11 }
 0x4f5   :  { %v711_v12 = vpop.f32.mrb[24].mxu1  ;;  %v761_v13 = vpop.f32.mrb[12].mxu0 }
 0x4f6   :  { %v4898_v14 = vpop.f32.mrb[25].mxu1  ;;  %v4904_v15 = vpop.f32.mrb[13].mxu0  ;;  %v882_v16 = vsel %vm470_vm12, %v761_v13, -inf  ;;  %v879_v17 = vsel %vm470_vm12, %v711_v12, -inf }
 0x4f7   :  { %883 = vmax.xlane.f32.xlu1 %v882_v16  ;;  %v764_v19 = vpop.f32.mrb[14].mxu0  ;;  %880 = vmax.xlane.f32.xlu0 %v879_v17  ;;  %v714_v20 = vpop.f32.mrb[26].mxu1 }
 0x4f8   :  { %v4899_v21 = vpop.f32.mrb[27].mxu1  ;;  %v4905_v22 = vpop.f32.mrb[15].mxu0 }
 0x4fd   :  { %v811_v23 = vpop.f32.mrb[28].mxu1  ;;  %v5724_v24 = vpop.f32.mrb[16].mxu0 }
 0x4fe   :  { %v4910_v25 = vpop.f32.mrb[29].mxu1  ;;  %v4916_v26 = vpop.f32.mrb[17].mxu0  ;;  %v885_v27 = vsel %vm470_vm12, %v811_v23, -inf  ;;  %v888_v37 = vsel %vm470_vm12, %v5724_v24, -inf }
 0x4ff   :  { %v864_v28 = vpop.f32.mrb[18].mxu0  ;;  %886 = vmax.xlane.f32.xlu0 %v885_v27  ;;  %v814_v29 = vpop.f32.mrb[30].mxu1 }
 0x500   :  { %v4911_v30 = vpop.f32.mrb[31].mxu1  ;;  %v4917_v31 = vpop.f32.mrb[19].mxu0 }
 0x507   :  { %v869_v32 = vpop.xlane.xlu1 %868 }
 0x508   :  { %v891_v33 = vsub.f32 %v511_v53, %v869_v32  ;;  %1107 = vrot.lane.b32.xlu1 %v5704_v48, %s5494_s4 }
 0x509   :  { %v872_v38 = vpop.xlane.xlu0 %871 }
 0x50a   :  { %v899_v34 = vmul.f32 1.442695, %v891_v33  ;;  %v892_v39 = vsub.f32 %v557_v57, %v872_v38 }
 0x50c   :  { %5454 = vpow2.f32 %v899_v34  ;;  %v901_v40 = vmul.f32 1.442695, %v892_v39 }
 0x50e   :  { %5456 = vpow2.f32 %v901_v40 }
 0x516   :  { %v5455_v35 = vpop.eup %5454 }
 0x517   :  { %v915_v36 = vsel %vm470_vm12, %v5455_v35, 0.0 }
 0x518   :  { %916 = vadd.xlane.f32.xlu0 %v915_v36  ;;  %v5736_v41 = vpop.eup %5456 }
 0x519   :  { %v918_v42 = vsel %vm470_vm12, %v5736_v41, 0.0 }
 0x52c   :  { %889 = vmax.xlane.f32.xlu1 %v888_v37 }
 0x52e   :  { %1058 = vrot.lane.b32.xlu0 %v5702_v47, %s5494_s4 }
 0x53d   :  { %1203 = vrot.lane.b32.xlu1 %v5704_v48, %s5495_s15 }
 0x561   :  { %919 = vadd.xlane.f32.xlu1 %v918_v42 }
 0x572   :  { %1155 = vrot.lane.b32.xlu1 %v5702_v47, %s5495_s15 }
 0x57c   :  { %v878_v43 = vpop.xlane.xlu0 %877 }
 0x57d   :  { %v894_v44 = vsub.f32 %v661_v3, %v878_v43 }
 0x57f   :  { %v905_v50 = vmul.f32 1.442695, %v894_v44 }
 0x580   :  { %v875_v45 = vpop.xlane.xlu0 %874 }
 0x581   :  { %v893_v46 = vsub.f32 %v609_v1, %v875_v45  ;;  %v1381_v45 = vld [vmem:[%s6602_s5 + $0x408] sm:$0x77] }
 0x583   :  { %v903_v49 = vmul.f32 1.442695, %v893_v46 }
 0x584   :  { %v881_v51 = vpop.xlane.xlu0 %880  ;;  %v884_v52 = vpop.xlane.xlu1 %883 }
 0x585   :  { %5458 = vpow2.f32 %v903_v49  ;;  %v895_v53 = vsub.f32 %v711_v12, %v881_v51  ;;  %v896_v54 = vsub.f32 %v761_v13, %v884_v52 }
 0x586   :  { %5460 = vpow2.f32 %v905_v50  ;;  %v4502_v50 = vcombine.high %v1381_v45, %v1381_v45 }
 0x587   :  { %v907_v55 = vmul.f32 1.442695, %v895_v53  ;;  %v909_v56 = vmul.f32 1.442695, %v896_v54  ;;  %v1380_v54 = vld [vmem:[%s6602_s5 + $0x400] sm:$0x77] }
 0x588   :  { %v1108_v14 = vpop.permute.xlu1 %1107 }
 0x589   :  { %5462 = vpow2.f32 %v907_v55 }
 0x58a   :  { %5464 = vpow2.f32 %v909_v56  ;;  %v4500_v56 = vcombine.high %v1380_v54, %v1380_v54 }
 0x58c   :  { %v887_v57 = vpop.xlane.xlu0 %886 }
 0x58d   :  { %v897_v59 = vsub.f32 %v811_v23, %v887_v57  ;;  %v4499_v57 = vcombine.low %v1380_v54, %v1380_v54  ;;  %v5167_v54 = vld [vmem:[%s6602_s5 + $0x220] ss:$16 sps:$4 sm:$0xff]  }
 0x58f   :  { %v5459_v60 = vpop.eup %5458  ;;  %v911_v61 = vmul.f32 1.442695, %v897_v59 }
 0x590   :  { %v921_v62 = vsel %vm470_vm12, %v5459_v60, 0.0  ;;  %v5461_v63 = vpop.eup %5460 }
 0x591   :  { %5466 = vpow2.f32 %v911_v61  ;;  %922 = vadd.xlane.f32.xlu0 %v921_v62  ;;  %v924_v4 = vsel %vm470_vm12, %v5461_v63, 0.0  ;;  %v5151_v62 = vld [vmem:[%s6602_s5 + $0x4] ss:$16 sps:$4 sm:$0xff]  }
 0x593   :  { %v5743_v1 = vpop.eup %5462 }
 0x594   :  { %v927_v3 = vsel %vm470_vm12, %v5743_v1, 0.0  ;;  %v5748_v5 = vpop.eup %5464 }
 0x595   :  { %928 = vadd.xlane.f32.xlu0 %v927_v3  ;;  %v930_v6 = vsel %vm470_vm12, %v5748_v5, 0.0  ;;  %v1378_v3 = vld [vmem:[%s6603_s1] sm:$0x3] }
 0x596   :  { %925 = vadd.xlane.f32.xlu1 %v924_v4  ;;  %v4501_v4 = vcombine.low %v1381_v45, %v1381_v45 }
 0x59a   :  { %931 = vadd.xlane.f32.xlu1 %v930_v6 }
 0x59b   :  { %v5752_v7 = vpop.eup %5466 }
 0x59c   :  { %v933_v8 = vsel %vm470_vm12, %v5752_v7, 0.0 }
 0x59d   :  { %934 = vadd.xlane.f32.xlu0 %v933_v8  ;;  %v1379_v8 = vpack.c.bf16 %v1378_v3, %v1378_v3 }
 0x5a5   :  { %v917_v9 = vpop.xlane.xlu0 %916 }
 0x5a6   :  { %5468 = vrcp.f32 %v917_v9 }
 0x5a9   :  { %v1059_v12 = vpop.permute.xlu0 %1058 }
 0x5aa   :  { %v1064_v15 = vsel %vm213_vm10, %v1059_v12, 0  ;;  %v5154_v12 = vld [vmem:[%s6602_s5 + $0x24] ss:$16 sps:$4 sm:$0xff]  }
 0x5b0   :  { %v5469_v10 = vpop.eup %5468 }
 0x5b1   :  { %v947_v11 = vmul.f32 %v5469_v10, %v5455_v35  ;;  %v1426_v10 = vsel %vm1418_vm13, %v4501_v4, 0 }
 0x5b3   :  { %1299 = vrot.lane.b32.xlu0 %v5704_v48, %s5496_s16  ;;  %v955_v13 = vpack.c.bf16 %v947_v11, %v947_v11  ;;  %v5149_v11 = vld [vmem:[%s6602_s5] ss:$16 sps:$4 sm:$0xff]  }
 0x5b5   :  { %4921 = vmatmul.mubr.msk.bf16.vlgmr.msra.gmra.mrb[32].mxu1 %vm470_vm12, %v955_v13 }
 0x5b6   :  { %4931 = vmatpush3.bf16.msra.mxu1 %v1064_v15  ;;  %4932 = vmatprep.mubr.msk.bf16.mxu1 %vm5487_vm0, %v5486_v0  ;;  %v1513_v15 = vpack.c.bf16 %v5582_v18, %v5582_v18 }
 0x5b7   :  { %277 = vrot.lane.b32.xlu0 %v5582_v18, %s5493_s30  ;;  %4942 = vmatprep.subr.bf16.mxu1 %v5486_v0  ;;  %v5160_v18 = vld [vmem:[%s6602_s5 + $0x2c] ss:$16 sps:$4 sm:$0xff]  }
 0x5b9   :  { %v890_v16 = vpop.xlane.xlu1 %889 }
 0x5ba   :  { %v898_v17 = vsub.f32 %v5724_v24, %v890_v16  ;;  %v1113_v24 = vsel %vm213_vm10, %v1108_v14, 0  ;;  %v5157_v14 = vld [vmem:[%s6602_s5 + $0xc] ss:$16 sps:$4 sm:$0xff]   ;;  %v5152_v16 = vld [vmem:[%s6602_s5 + $0x20] ss:$16 sps:$4 sm:$0xff]  }
 0x5bc   :  { %v913_v19 = vmul.f32 1.442695, %v898_v17 }
 0x5bd   :  { %v1204_v21 = vpop.permute.xlu1 %1203 }
 0x5be   :  { %5470 = vpow2.f32 %v913_v19  ;;  %v1209_v42 = vsel %vm213_vm10, %v1204_v21, 0  ;;  %v5155_v19 = vld [vmem:[%s6602_s5 + $0x8] ss:$16 sps:$4 sm:$0xff]  }
 0x5bf   :  { %v5158_v21 = vld [vmem:[%s6602_s5 + $0x28] ss:$16 sps:$4 sm:$0xff]  }
 0x5c8   :  { %v5766_v48 = vpop.eup %5470 }
 0x5c9   :  { %v936_v20 = vsel %vm470_vm12, %v5766_v48, 0.0 }
 0x5ca   :  { %937 = vadd.xlane.f32.xlu1 %v936_v20 }
 0x5db   :  { %1251 = vrot.lane.b32.xlu1 %v5702_v47, %s5496_s16 }
 0x5ee   :  { %v920_v22 = vpop.xlane.xlu1 %919 }
 0x5ef   :  { %5472 = vrcp.f32 %v920_v22 }
 0x5f2   :  { %v1156_v28 = vpop.permute.xlu1 %1155 }
 0x5f3   :  { %v1161_v36 = vsel %vm213_vm10, %v1156_v28, 0 }
 0x5f9   :  { %v5473_v23 = vpop.eup %5472 }
 0x5fa   :  { %v948_v25 = vmul.f32 %v5473_v23, %v5736_v41 }
 0x5fc   :  { %v956_v26 = vpack.c.bf16 %v948_v25, %v948_v25 }
 0x5fe   :  { %4927 = vmatmul.mubr.msk.bf16.vlgmr.msra.gmra.mrb[20].mxu0 %vm470_vm12, %v956_v26 }
 0x5ff   :  { %4937 = vmatpush3.bf16.msra.mxu0 %v1113_v24  ;;  %4938 = vmatprep.mubr.msk.bf16.mxu0 %vm5487_vm0, %v5486_v0 }
 0x600   :  { %4948 = vmatprep.subr.bf16.mxu0 %v5486_v0 }
 0x61e   :  { %v923_v27 = vpop.xlane.xlu0 %922 }
 0x61f   :  { %5474 = vrcp.f32 %v923_v27 }
 0x622   :  { %v929_v47 = vpop.xlane.xlu0 %928 }
 0x623   :  { %5476 = vrcp.f32 %v929_v47  ;;  %v926_v29 = vpop.xlane.xlu1 %925 }
 0x624   :  { %5478 = vrcp.f32 %v926_v29 }
 0x627   :  { %v932_v30 = vpop.xlane.xlu1 %931 }
 0x628   :  { %5480 = vrcp.f32 %v932_v30 }
 0x629   :  { %v5475_v31 = vpop.eup %5474 }
 0x62a   :  { %v949_v32 = vmul.f32 %v5475_v31, %v5459_v60  ;;  %v935_v41 = vpop.xlane.xlu0 %934 }
 0x62b   :  { %5482 = vrcp.f32 %v935_v41 }
 0x62c   :  { %v957_v33 = vpack.c.bf16 %v949_v32, %v949_v32 }
 0x62d   :  { %v5477_v34 = vpop.eup %5476 }
 0x62e   :  { %v5479_v35 = vpop.eup %5478  ;;  %4933 = vmatmul.mubr.msk.bf16.vlgmr.msra.gmra.mrb[36].mxu1 %vm470_vm12, %v957_v33  ;;  %v951_v38 = vmul.f32 %v5477_v34, %v5743_v1  ;;  %v1300_v46 = vpop.permute.xlu0 %1299  ;;  %v5497_v1 = vmov 0  }
 0x62f   :  { %v950_v37 = vmul.f32 %v5479_v35, %v5461_v63  ;;  %4943 = vmatpush3.bf16.msra.mxu1 %v1161_v36  ;;  %4944 = vmatprep.mubr.msk.bf16.mxu1 %vm5487_vm0, %v5486_v0  ;;  %v1305_v51 = vsel %vm213_vm10, %v1300_v46, 0 }
 0x630   :  { %4954 = vmatprep.subr.bf16.mxu1 %v5486_v0  ;;  %v959_v43 = vpack.c.bf16 %v951_v38, %v951_v38 }
 0x631   :  { %v958_v39 = vpack.c.bf16 %v950_v37, %v950_v37 }
 0x632   :  { %v5481_v40 = vpop.eup %5480  ;;  %v278_v63 = vpop.permute.xlu0 %277 }
 0x633   :  { %4939 = vmatmul.mubr.msk.bf16.vlgmr.msra.gmra.mrb[24].mxu0 %vm470_vm12, %v958_v39  ;;  %v952_v44 = vmul.f32 %v5481_v40, %v5748_v5  ;;  %v1514_v6 = vpack.c.bf16 %v278_v63, %v278_v63  ;;  %v5178_v63 = vld [vmem:[%s6602_s5 + $0x4c] ss:$16 sps:$4 sm:$0xff]  }
 0x634   :  { %4949 = vmatpush3.bf16.msra.mxu0 %v1209_v42  ;;  %4950 = vmatprep.mubr.msk.bf16.mxu0 %vm5487_vm0, %v5486_v0 }
 0x635   :  { %4960 = vmatprep.subr.bf16.mxu0 %v5486_v0  ;;  %v960_v49 = vpack.c.bf16 %v952_v44, %v952_v44  ;;  %v5483_v52 = vpop.eup %5482  ;;  %v5824_v13 = vunpack.c.l.b16 %v1514_v6 }
 0x636   :  { %4945 = vmatmul.mubr.msk.bf16.vlgmr.msra.gmra.mrb[40].mxu1 %vm470_vm12, %v959_v43  ;;  %v953_v55 = vmul.f32 %v5483_v52, %v5752_v7  ;;  %v5166_v52 = vld [vmem:[%s6602_s5 + $0x20c] ss:$16 sps:$4 sm:$0xff]  }
 0x637   :  { %4956 = vmatprep.mubr.msk.bf16.mxu1 %vm5487_vm0, %v5486_v0  ;;  %v1527_v17 = vrot.slane %v5824_v13, 7 }
 0x638   :  { %v961_v61 = vpack.c.bf16 %v953_v55, %v953_v55  ;;  %v5169_v55 = vld [vmem:[%s6602_s5 + $0x224] ss:$16 sps:$4 sm:$0xff]  }
 0x63b   :  { %4951 = vmatmul.mubr.msk.bf16.vlgmr.msra.gmra.mrb[28].mxu0 %vm470_vm12, %v960_v49 }
 0x63c   :  { %4961 = vmatpush3.bf16.msra.mxu0 %v1305_v51  ;;  %4962 = vmatprep.mubr.msk.bf16.mxu0 %vm5487_vm0, %v5486_v0  ;;  %v1420_v0 = vsel %vm1418_vm13, %v4499_v57, 0  ;;  %v5163_v51 = vld [vmem:[%s6602_s5 + $0x204] ss:$16 sps:$4 sm:$0xff]   ;;  %v5172_v57 = vld [vmem:[%s6602_s5 + $0x22c] ss:$16 sps:$4 sm:$0xff]   ;;  %vm1373_vm0 = vcmask 130048  }
 0x63d   :  { %4505 = vmatprep.subr.msk.bf16.mxu0 %vm1418_vm13, %v4502_v50  ;;  %v5161_v50 = vld [vmem:[%s6602_s5 + $0x200] ss:$16 sps:$4 sm:$0xff]  }
 0x657   :  { %v938_v53 = vpop.xlane.xlu1 %937 }
 0x658   :  { %5484 = vrcp.f32 %v938_v53  ;;  %v5164_v53 = vld [vmem:[%s6602_s5 + $0x208] ss:$16 sps:$4 sm:$0xff]  }
 0x65b   :  { %v1252_v59 = vpop.permute.xlu1 %1251 }
 0x65c   :  { %v1257_v60 = vsel %vm213_vm10, %v1252_v59, 0 }
 0x65d   :  { %4955 = vmatpush3.bf16.msra.mxu1 %v1257_v60 }
 0x65e   :  { %4503 = vmatprep.subr.msk.bf16.mxu1 %vm1418_vm13, %v4500_v56  ;;  %v5170_v56 = vld [vmem:[%s6602_s5 + $0x228] ss:$16 sps:$4 sm:$0xff]  }
 0x660   :  { %4957 = vmatmul.mubr.msk.bf16.vlgmr.msra.gmra.mrb[44].mxu1 %vm470_vm12, %v961_v61 }
 0x661   :  { %1432 = vmatpush1.bf16.msra.mxu1 %v1420_v0  ;;  %1463 = vmatprep.mubr.bf16.mxu1 %v5497_v1 }
 0x662   :  { %v5485_v5 = vpop.eup %5484  ;;  %1574 = vmatprep.subr.bf16.mxu1 %v5151_v62  ;;  %v5175_v62 = vld [vmem:[%s6602_s5 + $0x44] ss:$16 sps:$4 sm:$0xff]  }
 0x663   :  { %v954_v7 = vmul.f32 %v5485_v5, %v5766_v48  ;;  %v5842_v48 = vunpack.c.l.b16 %v1513_v15 }
 0x665   :  { %v962_v9 = vpack.c.bf16 %v954_v7, %v954_v7  ;;  %v1529_v20 = vsel %vm1528_vm15, %v1527_v17, %v5842_v48 }
 0x666   :  { %v1530_v22 = vpack.c.b16 %v1529_v20, %v1529_v20 }
 0x667   :  { %4963 = vmatmul.mubr.msk.bf16.vlgmr.msra.gmra.mrb[32].mxu0 %vm470_vm12, %v962_v9 }
 0x668   :  { %4504 = vmatmul.mubr.msk.bf16.vlgmr.msra.gmra.mrb[48].mxu1 %vm1414_vm14, %v1379_v8  ;;  %1473 = vmatpush1.bf16.msra.mxu0 %v1426_v10 }
 0x669   :  { %1575 = vmatpush1.bf16.msra.mxu1 %v5149_v11  ;;  %1504 = vmatprep.mubr.bf16.mxu0 %v5497_v1 }
 0x66a   :  { %1576 = vmatprep.subr.bf16.mxu1 %v5154_v12  ;;  %1606 = vmatprep.mubr.bf16.mxu1 %v5497_v1 }
 0x66b   :  { %1615 = vmatprep.subr.bf16.mxu0 %v5157_v14 }
 0x66d   :  { %1577 = vmatpush1.bf16.msra.mxu1 %v5152_v16 }
 0x66e   :  { %1720 = vmatprep.subr.bf16.mxu1 %v5163_v51 }
 0x66f   :  { %4506 = vmatmul.mubr.msk.bf16.vlgmr.msra.gmra.mrb[36].mxu0 %vm1414_vm14, %v1379_v8 }
 0x670   :  { %1616 = vmatpush1.bf16.msra.mxu0 %v5155_v19  ;;  %1647 = vmatprep.mubr.bf16.mxu0 %v5497_v1 }
 0x671   :  { %1617 = vmatprep.subr.bf16.mxu0 %v5160_v18 }
 0x674   :  { %4515 = vmatmul.mubr.msk.bf16.vlgmr.msra.gmra.mrb[48].mxu1 %vm297_vm11, %v1530_v22  ;;  %1618 = vmatpush1.bf16.msra.mxu0 %v5158_v21 }
 0x675   :  { %1752 = vmatprep.mubr.bf16.mxu1 %v5497_v1  ;;  %1721 = vmatpush1.bf16.msra.mxu1 %v5161_v50 }
 0x676   :  { %1761 = vmatprep.subr.bf16.mxu0 %v5166_v52  ;;  %1722 = vmatprep.subr.bf16.mxu1 %v5169_v55  ;;  %v5182_v55 = vld [vmem:[%s6602_s5 + $0x68] ss:$16 sps:$4 sm:$0xff]  }
 0x679   :  { %1723 = vmatpush1.bf16.msra.mxu1 %v5167_v54  ;;  %v5179_v54 = vld [vmem:[%s6602_s5 + $0x60] ss:$16 sps:$4 sm:$0xff]  }
 0x67a   :  { %1860 = vmatprep.subr.bf16.mxu1 %v5175_v62 }
 0x67b   :  { %4516 = vmatmul.mubr.msk.bf16.vlgmr.msra.gmra.mrb[36].mxu0 %vm297_vm11, %v1530_v22 }
 0x67c   :  { %1793 = vmatprep.mubr.bf16.mxu0 %v5497_v1  ;;  %1762 = vmatpush1.bf16.msra.mxu0 %v5164_v53 }
 0x67d   :  { %1763 = vmatprep.subr.bf16.mxu0 %v5172_v57  ;;  %v5190_v57 = vld [vmem:[%s6602_s5 + $0x24c] ss:$16 sps:$4 sm:$0xff]  }
 0x680   :  { %1764 = vmatpush1.bf16.msra.mxu0 %v5170_v56  ;;  %v5187_v56 = vld [vmem:[%s6602_s5 + $0x244] ss:$16 sps:$4 sm:$0xff]  }
 0x681   :  { %1901 = vmatprep.subr.bf16.mxu0 %v5178_v63  ;;  %v5193_v63 = vld [vmem:[%s6602_s5 + $0x264] ss:$16 sps:$4 sm:$0xff]  }
 0x688   :  { %v5858_v23 = vpop.f32.mrb[32].mxu1 }
 0x689   :  { %v4922_v25 = vpop.f32.mrb[33].mxu1 }
 0x68a   :  { %v1008_v26 = vpop.f32.mrb[34].mxu1 }
 0x68b   :  { %v4923_v24 = vpop.f32.mrb[35].mxu1 }
 0x6d1   :  { %v5860_v27 = vpop.f32.mrb[20].mxu0 }
 0x6d2   :  { %v4928_v28 = vpop.f32.mrb[21].mxu0 }
 0x6d3   :  { %v1054_v47 = vpop.f32.mrb[22].mxu0 }
 0x6d4   :  { %v4929_v29 = vpop.f32.mrb[23].mxu0 }
 0x701   :  { %v1100_v30 = vpop.f32.mrb[36].mxu1 }
 0x702   :  { %v4934_v31 = vpop.f32.mrb[37].mxu1 }
 0x703   :  { %v1103_v32 = vpop.f32.mrb[38].mxu1 }
 0x704   :  { %v4935_v33 = vpop.f32.mrb[39].mxu1 }
 0x706   :  { %v1149_v34 = vpop.f32.mrb[24].mxu0 }
 0x707   :  { %v5121_v35 = vpack.i.bf16 %v1100_v30, %v1149_v34  ;;  %v4940_v36 = vpop.f32.mrb[25].mxu0 }
 0x708   :  { %v1152_v37 = vpop.f32.mrb[26].mxu0 }
 0x709   :  { %v1197_v38 = vpop.f32.mrb[40].mxu1  ;;  %5122 = vrot.lane.b32.xlu1 %v5121_v35, %s5498_s13  ;;  %v4941_v39 = vpop.f32.mrb[27].mxu0 }
 0x70a   :  { %v4946_v40 = vpop.f32.mrb[41].mxu1 }
 0x70b   :  { %v1200_v41 = vpop.f32.mrb[42].mxu1  ;;  %v5173_v40 = vld [vmem:[%s6602_s5 + $0x40] ss:$16 sps:$4 sm:$0xff]  }
 0x70c   :  { %v4947_v42 = vpop.f32.mrb[43].mxu1  ;;  %v5176_v41 = vld [vmem:[%s6602_s5 + $0x48] ss:$16 sps:$4 sm:$0xff]  }
 0x70e   :  { %v1245_v43 = vpop.f32.mrb[28].mxu0 }
 0x70f   :  { %v5126_v44 = vpack.i.bf16 %v1197_v38, %v1245_v43  ;;  %v4952_v45 = vpop.f32.mrb[29].mxu0 }
 0x710   :  { %v1248_v46 = vpop.f32.mrb[30].mxu0 }
 0x711   :  { %5127 = vrot.lane.b32.xlu0 %v5126_v44, %s5499_s14  ;;  %v4953_v49 = vpop.f32.mrb[31].mxu0  ;;  %v5181_v46 = vld [vmem:[%s6602_s5 + $0x64] ss:$16 sps:$4 sm:$0xff]  }
 0x712   :  { %v5184_v49 = vld [vmem:[%s6602_s5 + $0x6c] ss:$16 sps:$4 sm:$0xff]  }
 0x733   :  { %v1293_v59 = vpop.f32.mrb[44].mxu1 }
 0x734   :  { %1365 = vrot.lane.b32.xlu0 %v1293_v59, %s5500_s26  ;;  %v4958_v60 = vpop.f32.mrb[45].mxu1  ;;  %v1814_v59 = vrot.slane %v5842_v48, 1 }
 0x735   :  { %v1296_v61 = vpop.f32.mrb[46].mxu1 }
 0x736   :  { %v4959_v0 = vpop.f32.mrb[47].mxu1  ;;  %v1815_v60 = vsel %vm1528_vm15, %v5824_v13, %v1814_v59  ;;  %v5185_v61 = vld [vmem:[%s6602_s5 + $0x240] ss:$16 sps:$4 sm:$0xff]   ;;  %v5248_v59 = vld [vmem:[%s6602_s5 + $0x108] ss:$16 sps:$4 sm:$0xff]  }
 0x737   :  { %v5188_v0 = vld [vmem:[%s6602_s5 + $0x248] ss:$16 sps:$4 sm:$0xff]   ;;  %v1816_v62 = vpack.c.b16 %v1815_v60, %v1815_v60 }
 0x73a   :  { %v1341_v3 = vpop.f32.mrb[32].mxu0 }
 0x73b   :  { %1367 = vrot.lane.b32.xlu1 %v1341_v3, %s5500_s26  ;;  %v4964_v4 = vpop.f32.mrb[33].mxu0  ;;  %v5196_v3 = vld [vmem:[%s6602_s5 + $0x26c] ss:$16 sps:$4 sm:$0xff]  }
 0x73c   :  { %v1344_v5 = vpop.f32.mrb[34].mxu0  ;;  %v5191_v4 = vld [vmem:[%s6602_s5 + $0x260] ss:$16 sps:$4 sm:$0xff]  }
 0x73d   :  { %v4965_v6 = vpop.f32.mrb[35].mxu0  ;;  %v5194_v5 = vld [vmem:[%s6602_s5 + $0x268] ss:$16 sps:$4 sm:$0xff]  }
 0x73e   :  { %v5199_v6 = vld [vmem:[%s6602_s5 + $0x84] ss:$16 sps:$4 sm:$0xff]  }
 0x77b   :  { %v5123_v7 = vpop.permute.xlu1 %5122 }
 0x77c   :  { %v5125_v9 = vunpack.i.h.bf16 %v5123_v7  ;;  %v5124_v16 = vunpack.i.l.bf16 %v5123_v7  ;;  %v5202_v7 = vld [vmem:[%s6602_s5 + $0x8c] ss:$16 sps:$4 sm:$0xff]  }
 0x77e   :  { %v1371_v11 = vsel %vm470_vm12, %v5858_v23, %v5125_v9  ;;  %v1372_v18 = vsel %vm470_vm12, %v5860_v27, %v5124_v16  ;;  %v5200_v9 = vld [vmem:[%s6602_s5 + $0x88] ss:$16 sps:$4 sm:$0xff]   ;;  %v5211_v16 = vld [vmem:[%s6602_s5 + $0x284] ss:$16 sps:$4 sm:$0xff]  }
 0x783   :  { %v5128_v8 = vpop.permute.xlu0 %5127 }
 0x784   :  { %v5130_v10 = vunpack.i.h.bf16 %v5128_v8  ;;  %v5129_v17 = vunpack.i.l.bf16 %v5128_v8  ;;  %v5197_v8 = vld [vmem:[%s6602_s5 + $0x80] ss:$16 sps:$4 sm:$0xff]  }
 0x786   :  { %v1374_v14 = vsel %vm1373_vm0, %v1371_v11, %v5130_v10  ;;  %v1375_v22 = vsel %vm1373_vm0, %v1372_v18, %v5129_v17  ;;  %v5205_v11 = vld [vmem:[%s6602_s5 + $0xa4] ss:$16 sps:$4 sm:$0xff]   ;;  %v5214_v17 = vld [vmem:[%s6602_s5 + $0x28c] ss:$16 sps:$4 sm:$0xff]   ;;  %v2094_v18 = vrot.slane %v5842_v48, 2 }
 0x7a6   :  { %v1366_v12 = vpop.permute.xlu0 %1365 }
 0x7a7   :  { %v1376_v15 = vsel %vm206_vm2, %v1374_v14, %v1366_v12  ;;  %v5208_v12 = vld [vmem:[%s6602_s5 + $0xac] ss:$16 sps:$4 sm:$0xff]   ;;  %v5203_v14 = vld [vmem:[%s6602_s5 + $0xa0] ss:$16 sps:$4 sm:$0xff]  }
 0x7a8   :  { %v1660_v19 = vpack.c.bf16 %v1376_v15, %v1376_v15  ;;  %v5206_v15 = vld [vmem:[%s6602_s5 + $0xa8] ss:$16 sps:$4 sm:$0xff]  }
 0x7aa   :  { %v1672_v20 = vunpack.c.l.b16 %v1660_v19  ;;  %v2095_v19 = vrot.slane %v5824_v13, 1 }
 0x7ac   :  { %v1954_v28 = vrot.slane %v1672_v20, 1  ;;  %v2235_v47 = vrot.slane %v1672_v20, 2  ;;  %v2517_v23 = vrot.slane %v1672_v20, 3  ;;  %v2799_v29 = vrot.slane %v1672_v20, 4 }
 0x7ad   :  { %v1368_v21 = vpop.permute.xlu1 %1367  ;;  %v3081_v30 = vrot.slane %v1672_v20, 5  ;;  %v3363_v31 = vrot.slane %v1672_v20, 6  ;;  %v3645_v38 = vrot.slane %v1672_v20, 7 }
 0x7ae   :  { %v1377_v25 = vsel %vm206_vm2, %v1375_v22, %v1368_v21  ;;  %v5209_v21 = vld [vmem:[%s6602_s5 + $0x280] ss:$16 sps:$4 sm:$0xff]   ;;  %v5212_v22 = vld [vmem:[%s6602_s5 + $0x288] ss:$16 sps:$4 sm:$0xff]  }
 0x7af   :  { %v1661_v26 = vpack.c.bf16 %v1377_v25, %v1377_v25 }
 0x7b1   :  { %v1673_v24 = vunpack.c.l.b16 %v1661_v26  ;;  %v5217_v26 = vld [vmem:[%s6602_s5 + $0x2a4] ss:$16 sps:$4 sm:$0xff]  }
 0x7b3   :  { %v1674_v32 = vrot.slane %v1673_v24, 7  ;;  %v1955_v33 = vsel %vm1528_vm15, %v1673_v24, %v1954_v28  ;;  %v2236_v34 = vrot.slane %v1673_v24, 1  ;;  %v2518_v35 = vrot.slane %v1673_v24, 2  ;;  %v5215_v28 = vld [vmem:[%s6602_s5 + $0x2a0] ss:$16 sps:$4 sm:$0xff]  }
 0x7b4   :  { %v2800_v36 = vrot.slane %v1673_v24, 3  ;;  %v3082_v27 = vrot.slane %v1673_v24, 4  ;;  %v3364_v37 = vrot.slane %v1673_v24, 5  ;;  %v3646_v44 = vrot.slane %v1673_v24, 6  ;;  %v5220_v24 = vld [vmem:[%s6602_s5 + $0x2ac] ss:$16 sps:$4 sm:$0xff]  }
 0x7b5   :  { %v1675_v39 = vsel %vm1528_vm15, %v1674_v32, %v1672_v20  ;;  %v5907_v42 = vsel %vm1528_vm15, %v2236_v34, %v2235_v47  ;;  %v5910_v43 = vsel %vm1528_vm15, %v2518_v35, %v2517_v23  ;;  %v1956_v10 = vpack.c.b16 %v1955_v33, %v1955_v33  ;;  %v5218_v47 = vld [vmem:[%s6602_s5 + $0x2a8] ss:$16 sps:$4 sm:$0xff]   ;;  %v5223_v23 = vld [vmem:[%s6602_s5 + $0xc4] ss:$16 sps:$4 sm:$0xff]   ;;  %v5232_v34 = vld [vmem:[%s6602_s5 + $0xec] ss:$16 sps:$4 sm:$0xff]  }
 0x7b6   :  { %v1676_v45 = vpack.c.b16 %v1675_v39, %v1675_v39  ;;  %v5919_v50 = vsel %vm1528_vm15, %v2800_v36, %v2799_v29  ;;  %v5922_v51 = vsel %vm1528_vm15, %v3082_v27, %v3081_v30  ;;  %v5925_v52 = vsel %vm1528_vm15, %v3364_v37, %v3363_v31  ;;  %v5226_v29 = vld [vmem:[%s6602_s5 + $0xcc] ss:$16 sps:$4 sm:$0xff]   ;;  %v5221_v30 = vld [vmem:[%s6602_s5 + $0xc0] ss:$16 sps:$4 sm:$0xff]   ;;  %v5224_v31 = vld [vmem:[%s6602_s5 + $0xc8] ss:$16 sps:$4 sm:$0xff]  }
 0x7b7   :  { %v5928_v53 = vsel %vm1528_vm15, %v3646_v44, %v3645_v38  ;;  %v2096_v20 = vsel %vm1528_vm15, %v2095_v19, %v2094_v18  ;;  %v5229_v32 = vld [vmem:[%s6602_s5 + $0xe4] ss:$16 sps:$4 sm:$0xff]   ;;  %v2238_v33 = vpack.c.b16 %v5907_v42, %v5907_v42  ;;  %v5227_v35 = vld [vmem:[%s6602_s5 + $0xe0] ss:$16 sps:$4 sm:$0xff]   ;;  %v5230_v36 = vld [vmem:[%s6602_s5 + $0xe8] ss:$16 sps:$4 sm:$0xff]   ;;  %v2520_v60 = vpack.c.b16 %v5910_v43, %v5910_v43 }
 0x7b8   :  { %4525 = vmatmul.mubr.msk.bf16.vlgmr.msra.gmra.mrb[48].mxu1 %vm297_vm11, %v1676_v45  ;;  %4526 = vmatmul.mubr.msk.bf16.vlgmr.msra.gmra.mrb[36].mxu0 %vm297_vm11, %v1676_v45  ;;  %v2097_v25 = vpack.c.b16 %v2096_v20, %v2096_v20  ;;  %v5235_v27 = vld [vmem:[%s6602_s5 + $0x2c4] ss:$16 sps:$4 sm:$0xff]   ;;  %v5238_v37 = vld [vmem:[%s6602_s5 + $0x2cc] ss:$16 sps:$4 sm:$0xff]   ;;  %v2377_v38 = vrot.slane %v5824_v13, 2  ;;  %v2376_v39 = vrot.slane %v5842_v48, 3  ;;  %v2802_v18 = vpack.c.b16 %v5919_v50, %v5919_v50 }
 0x7b9   :  { %1861 = vmatpush1.bf16.msra.mxu1 %v5173_v40  ;;  %1902 = vmatpush1.bf16.msra.mxu0 %v5176_v41  ;;  %v5233_v41 = vld [vmem:[%s6602_s5 + $0x2c0] ss:$16 sps:$4 sm:$0xff]   ;;  %v5236_v42 = vld [vmem:[%s6602_s5 + $0x2c8] ss:$16 sps:$4 sm:$0xff]   ;;  %v5241_v45 = vld [vmem:[%s6602_s5 + $0x2e4] ss:$16 sps:$4 sm:$0xff]  }
 0x7ba   :  { %1862 = vmatprep.subr.bf16.mxu1 %v5181_v46  ;;  %1903 = vmatprep.subr.bf16.mxu0 %v5184_v49  ;;  %v2378_v40 = vsel %vm1528_vm15, %v2377_v38, %v2376_v39  ;;  %v5244_v46 = vld [vmem:[%s6602_s5 + $0x2ec] ss:$16 sps:$4 sm:$0xff]   ;;  %v5239_v49 = vld [vmem:[%s6602_s5 + $0x2e0] ss:$16 sps:$4 sm:$0xff]   ;;  %v5254_v43 = vld [vmem:[%s6602_s5 + $0x128] ss:$16 sps:$4 sm:$0xff]   ;;  %v3084_v38 = vpack.c.b16 %v5922_v51, %v5922_v51 }
 0x7bb   :  { %1892 = vmatprep.mubr.bf16.mxu1 %v5497_v1  ;;  %1933 = vmatprep.mubr.bf16.mxu0 %v5497_v1  ;;  %v2379_v44 = vpack.c.b16 %v2378_v40, %v2378_v40  ;;  %v5272_v19 = vld [vmem:[%s6602_s5 + $0x148] ss:$16 sps:$4 sm:$0xff]   ;;  %v5277_v20 = vld [vmem:[%s6602_s5 + $0x164] ss:$16 sps:$4 sm:$0xff]   ;;  %v5304_v40 = vld [vmem:[%s6602_s5 + $0x1ac] ss:$16 sps:$4 sm:$0xff]  }
 0x7bc   :  { %v5278_v50 = vld [vmem:[%s6602_s5 + $0x168] ss:$16 sps:$4 sm:$0xff]   ;;  %v5301_v39 = vld [vmem:[%s6602_s5 + $0x1a4] ss:$16 sps:$4 sm:$0xff]  }
 0x7bd   :  { %1863 = vmatpush1.bf16.msra.mxu1 %v5179_v54  ;;  %1904 = vmatpush1.bf16.msra.mxu0 %v5182_v55  ;;  %v5242_v54 = vld [vmem:[%s6602_s5 + $0x2e8] ss:$16 sps:$4 sm:$0xff]   ;;  %v5247_v55 = vld [vmem:[%s6602_s5 + $0x104] ss:$16 sps:$4 sm:$0xff]  }
 0x7be   :  { %2000 = vmatprep.subr.bf16.mxu1 %v5187_v56  ;;  %2041 = vmatprep.subr.bf16.mxu0 %v5190_v57  ;;  %v5250_v56 = vld [vmem:[%s6602_s5 + $0x10c] ss:$16 sps:$4 sm:$0xff]   ;;  %v5245_v57 = vld [vmem:[%s6602_s5 + $0x100] ss:$16 sps:$4 sm:$0xff]   ;;  %v5302_v51 = vld [vmem:[%s6602_s5 + $0x1a8] ss:$16 sps:$4 sm:$0xff]  }
 0x7c4   :  { %4535 = vmatmul.mubr.msk.bf16.vlgmr.msra.gmra.mrb[48].mxu1 %vm297_vm11, %v1816_v62  ;;  %4536 = vmatmul.mubr.msk.bf16.vlgmr.msra.gmra.mrb[36].mxu0 %vm297_vm11, %v1816_v62  ;;  %v5251_v62 = vld [vmem:[%s6602_s5 + $0x120] ss:$16 sps:$4 sm:$0xff]  }
 0x7c5   :  { %2001 = vmatpush1.bf16.msra.mxu1 %v5185_v61  ;;  %2042 = vmatpush1.bf16.msra.mxu0 %v5188_v0  ;;  %v5253_v61 = vld [vmem:[%s6602_s5 + $0x124] ss:$16 sps:$4 sm:$0xff]   ;;  %v5256_v0 = vld [vmem:[%s6602_s5 + $0x12c] ss:$16 sps:$4 sm:$0xff]  }
 0x7c6   :  { %2002 = vmatprep.subr.bf16.mxu1 %v5193_v63  ;;  %2043 = vmatprep.subr.bf16.mxu0 %v5196_v3  ;;  %v5259_v63 = vld [vmem:[%s6602_s5 + $0x304] ss:$16 sps:$4 sm:$0xff]   ;;  %v5262_v3 = vld [vmem:[%s6602_s5 + $0x30c] ss:$16 sps:$4 sm:$0xff]  }
 0x7c7   :  { %2032 = vmatprep.mubr.bf16.mxu1 %v5497_v1  ;;  %2073 = vmatprep.mubr.bf16.mxu0 %v5497_v1 }
 0x7c9   :  { %2003 = vmatpush1.bf16.msra.mxu1 %v5191_v4  ;;  %2044 = vmatpush1.bf16.msra.mxu0 %v5194_v5  ;;  %v2659_v4 = vrot.slane %v5824_v13, 3  ;;  %v2658_v5 = vrot.slane %v5842_v48, 4 }
 0x7ca   :  { %2141 = vmatprep.subr.bf16.mxu1 %v5199_v6  ;;  %2182 = vmatprep.subr.bf16.mxu0 %v5202_v7  ;;  %v5257_v7 = vld [vmem:[%s6602_s5 + $0x300] ss:$16 sps:$4 sm:$0xff]  }
 0x7cb   :  { %v2660_v6 = vsel %vm1528_vm15, %v2659_v4, %v2658_v5  ;;  %v5325_v4 = vld [vmem:[%s6602_s5 + $0x1e4] ss:$16 sps:$4 sm:$0xff]   ;;  %v5328_v5 = vld [vmem:[%s6602_s5 + $0x1ec] ss:$16 sps:$4 sm:$0xff]  }
 0x7d0   :  { %4545 = vmatmul.mubr.msk.bf16.vlgmr.msra.gmra.mrb[48].mxu1 %vm297_vm11, %v1956_v10  ;;  %4546 = vmatmul.mubr.msk.bf16.vlgmr.msra.gmra.mrb[36].mxu0 %vm297_vm11, %v1956_v10  ;;  %v5265_v10 = vld [vmem:[%s6602_s5 + $0x324] ss:$16 sps:$4 sm:$0xff]  }
 0x7d1   :  { %2142 = vmatpush1.bf16.msra.mxu1 %v5197_v8  ;;  %2183 = vmatpush1.bf16.msra.mxu0 %v5200_v9  ;;  %v5260_v8 = vld [vmem:[%s6602_s5 + $0x308] ss:$16 sps:$4 sm:$0xff]   ;;  %v2661_v9 = vpack.c.b16 %v2660_v6, %v2660_v6  ;;  %v5323_v6 = vld [vmem:[%s6602_s5 + $0x1e0] ss:$16 sps:$4 sm:$0xff]  }
 0x7d2   :  { %2143 = vmatprep.subr.bf16.mxu1 %v5205_v11  ;;  %2184 = vmatprep.subr.bf16.mxu0 %v5208_v12  ;;  %v5268_v11 = vld [vmem:[%s6602_s5 + $0x32c] ss:$16 sps:$4 sm:$0xff]   ;;  %v5263_v12 = vld [vmem:[%s6602_s5 + $0x320] ss:$16 sps:$4 sm:$0xff]  }
 0x7d3   :  { %2173 = vmatprep.mubr.bf16.mxu1 %v5497_v1  ;;  %2214 = vmatprep.mubr.bf16.mxu0 %v5497_v1 }
 0x7d5   :  { %2144 = vmatpush1.bf16.msra.mxu1 %v5203_v14  ;;  %2185 = vmatpush1.bf16.msra.mxu0 %v5206_v15  ;;  %v5266_v14 = vld [vmem:[%s6602_s5 + $0x328] ss:$16 sps:$4 sm:$0xff]   ;;  %v5271_v15 = vld [vmem:[%s6602_s5 + $0x144] ss:$16 sps:$4 sm:$0xff]  }
 0x7d6   :  { %2282 = vmatprep.subr.bf16.mxu1 %v5211_v16  ;;  %2323 = vmatprep.subr.bf16.mxu0 %v5214_v17  ;;  %v5274_v16 = vld [vmem:[%s6602_s5 + $0x14c] ss:$16 sps:$4 sm:$0xff]   ;;  %v5269_v17 = vld [vmem:[%s6602_s5 + $0x140] ss:$16 sps:$4 sm:$0xff]  }
 0x7dc   :  { %4555 = vmatmul.mubr.msk.bf16.vlgmr.msra.gmra.mrb[48].mxu1 %vm297_vm11, %v2097_v25  ;;  %4556 = vmatmul.mubr.msk.bf16.vlgmr.msra.gmra.mrb[36].mxu0 %vm297_vm11, %v2097_v25  ;;  %v5283_v25 = vld [vmem:[%s6602_s5 + $0x344] ss:$16 sps:$4 sm:$0xff]  }
 0x7dd   :  { %2283 = vmatpush1.bf16.msra.mxu1 %v5209_v21  ;;  %2324 = vmatpush1.bf16.msra.mxu0 %v5212_v22  ;;  %v5280_v21 = vld [vmem:[%s6602_s5 + $0x16c] ss:$16 sps:$4 sm:$0xff]   ;;  %v5275_v22 = vld [vmem:[%s6602_s5 + $0x160] ss:$16 sps:$4 sm:$0xff]  }
 0x7de   :  { %2284 = vmatprep.subr.bf16.mxu1 %v5217_v26  ;;  %2325 = vmatprep.subr.bf16.mxu0 %v5220_v24  ;;  %v5286_v26 = vld [vmem:[%s6602_s5 + $0x34c] ss:$16 sps:$4 sm:$0xff]   ;;  %v2941_v24 = vrot.slane %v5824_v13, 4 }
 0x7df   :  { %2314 = vmatprep.mubr.bf16.mxu1 %v5497_v1  ;;  %2355 = vmatprep.mubr.bf16.mxu0 %v5497_v1 }
 0x7e1   :  { %2285 = vmatpush1.bf16.msra.mxu1 %v5215_v28  ;;  %2326 = vmatpush1.bf16.msra.mxu0 %v5218_v47  ;;  %v2940_v28 = vrot.slane %v5842_v48, 5 }
 0x7e2   :  { %2423 = vmatprep.subr.bf16.mxu1 %v5223_v23  ;;  %2464 = vmatprep.subr.bf16.mxu0 %v5226_v29  ;;  %v5281_v23 = vld [vmem:[%s6602_s5 + $0x340] ss:$16 sps:$4 sm:$0xff]   ;;  %v5284_v29 = vld [vmem:[%s6602_s5 + $0x348] ss:$16 sps:$4 sm:$0xff]  }
 0x7e3   :  { %v2942_v47 = vsel %vm1528_vm15, %v2941_v24, %v2940_v28  ;;  %v5358_v24 = vld [vmem:[%s6604_s6 + $0x124] ss:$8 sps:$4 sm:$0xff]   ;;  %v5353_v28 = vld [vmem:[%s6604_s6 + $0x20] ss:$8 sps:$4 sm:$0xff]  }
 0x7e8   :  { %4565 = vmatmul.mubr.msk.bf16.vlgmr.msra.gmra.mrb[48].mxu1 %vm297_vm11, %v2238_v33  ;;  %4566 = vmatmul.mubr.msk.bf16.vlgmr.msra.gmra.mrb[36].mxu0 %vm297_vm11, %v2238_v33  ;;  %v5287_v33 = vld [vmem:[%s6602_s5 + $0x360] ss:$16 sps:$4 sm:$0xff]  }
 0x7e9   :  { %2424 = vmatpush1.bf16.msra.mxu1 %v5221_v30  ;;  %2465 = vmatpush1.bf16.msra.mxu0 %v5224_v31  ;;  %v2943_v30 = vpack.c.b16 %v2942_v47, %v2942_v47  ;;  %v5289_v31 = vld [vmem:[%s6602_s5 + $0x364] ss:$16 sps:$4 sm:$0xff]   ;;  %v5356_v47 = vld [vmem:[%s6604_s6 + $0x120] ss:$8 sps:$4 sm:$0xff]  }
 0x7ea   :  { %2425 = vmatprep.subr.bf16.mxu1 %v5229_v32  ;;  %2466 = vmatprep.subr.bf16.mxu0 %v5232_v34  ;;  %v5292_v32 = vld [vmem:[%s6602_s5 + $0x36c] ss:$16 sps:$4 sm:$0xff]   ;;  %v5290_v34 = vld [vmem:[%s6602_s5 + $0x368] ss:$16 sps:$4 sm:$0xff]  }
 0x7eb   :  { %2455 = vmatprep.mubr.bf16.mxu1 %v5497_v1  ;;  %2496 = vmatprep.mubr.bf16.mxu0 %v5497_v1 }
 0x7ed   :  { %2426 = vmatpush1.bf16.msra.mxu1 %v5227_v35  ;;  %2467 = vmatpush1.bf16.msra.mxu0 %v5230_v36  ;;  %v5295_v35 = vld [vmem:[%s6602_s5 + $0x184] ss:$16 sps:$4 sm:$0xff]   ;;  %v5298_v36 = vld [vmem:[%s6602_s5 + $0x18c] ss:$16 sps:$4 sm:$0xff]  }
 0x7ee   :  { %2564 = vmatprep.subr.bf16.mxu1 %v5235_v27  ;;  %2605 = vmatprep.subr.bf16.mxu0 %v5238_v37  ;;  %v5293_v27 = vld [vmem:[%s6602_s5 + $0x180] ss:$16 sps:$4 sm:$0xff]   ;;  %v5296_v37 = vld [vmem:[%s6602_s5 + $0x188] ss:$16 sps:$4 sm:$0xff]  }
 0x7f4   :  { %4575 = vmatmul.mubr.msk.bf16.vlgmr.msra.gmra.mrb[48].mxu1 %vm297_vm11, %v2379_v44  ;;  %4576 = vmatmul.mubr.msk.bf16.vlgmr.msra.gmra.mrb[36].mxu0 %vm297_vm11, %v2379_v44  ;;  %v5310_v44 = vld [vmem:[%s6602_s5 + $0x38c] ss:$16 sps:$4 sm:$0xff]  }
 0x7f5   :  { %2565 = vmatpush1.bf16.msra.mxu1 %v5233_v41  ;;  %2606 = vmatpush1.bf16.msra.mxu0 %v5236_v42  ;;  %v5299_v41 = vld [vmem:[%s6602_s5 + $0x1a0] ss:$16 sps:$4 sm:$0xff]   ;;  %v5307_v42 = vld [vmem:[%s6602_s5 + $0x384] ss:$16 sps:$4 sm:$0xff]  }
 0x7f6   :  { %2566 = vmatprep.subr.bf16.mxu1 %v5241_v45  ;;  %2607 = vmatprep.subr.bf16.mxu0 %v5244_v46  ;;  %v3223_v45 = vrot.slane %v5824_v13, 5  ;;  %v3222_v46 = vrot.slane %v5842_v48, 6 }
 0x7f7   :  { %2596 = vmatprep.mubr.bf16.mxu1 %v5497_v1  ;;  %2637 = vmatprep.mubr.bf16.mxu0 %v5497_v1 }
 0x7f9   :  { %2567 = vmatpush1.bf16.msra.mxu1 %v5239_v49  ;;  %2608 = vmatpush1.bf16.msra.mxu0 %v5242_v54  ;;  %v3224_v49 = vsel %vm1528_vm15, %v3223_v45, %v3222_v46  ;;  %v5305_v54 = vld [vmem:[%s6602_s5 + $0x380] ss:$16 sps:$4 sm:$0xff]  }
 0x7fa   :  { %2705 = vmatprep.subr.bf16.mxu1 %v5247_v55  ;;  %2746 = vmatprep.subr.bf16.mxu0 %v5250_v56  ;;  %v5308_v55 = vld [vmem:[%s6602_s5 + $0x388] ss:$16 sps:$4 sm:$0xff]   ;;  %v3225_v56 = vpack.c.b16 %v3224_v49, %v3224_v49  ;;  %v5391_v49 = vld [vmem:[%s6604_s6 + $0x84] ss:$8 sps:$4 sm:$0xff]  }
 0x7fb   :  { %v5383_v45 = vld [vmem:[%s6604_s6 + $0x70] ss:$8 sps:$4 sm:$0xff]  }
 0x7fc   :  { %v5386_v46 = vld [vmem:[%s6604_s6 + $0x170] ss:$8 sps:$4 sm:$0xff]  }
 0x800   :  { %4585 = vmatmul.mubr.msk.bf16.vlgmr.msra.gmra.mrb[48].mxu1 %vm297_vm11, %v2520_v60  ;;  %4586 = vmatmul.mubr.msk.bf16.vlgmr.msra.gmra.mrb[36].mxu0 %vm297_vm11, %v2520_v60  ;;  %v5311_v60 = vld [vmem:[%s6602_s5 + $0x3a0] ss:$16 sps:$4 sm:$0xff]  }
 0x801   :  { %2706 = vmatpush1.bf16.msra.mxu1 %v5245_v57  ;;  %2747 = vmatpush1.bf16.msra.mxu0 %v5248_v59  ;;  %v5313_v57 = vld [vmem:[%s6602_s5 + $0x3a4] ss:$16 sps:$4 sm:$0xff]   ;;  %v5316_v59 = vld [vmem:[%s6602_s5 + $0x3ac] ss:$16 sps:$4 sm:$0xff]  }
 0x802   :  { %2707 = vmatprep.subr.bf16.mxu1 %v5253_v61  ;;  %2748 = vmatprep.subr.bf16.mxu0 %v5256_v0  ;;  %v5314_v61 = vld [vmem:[%s6602_s5 + $0x3a8] ss:$16 sps:$4 sm:$0xff]   ;;  %v5319_v0 = vld [vmem:[%s6602_s5 + $0x1c4] ss:$16 sps:$4 sm:$0xff]  }
 0x803   :  { %2737 = vmatprep.mubr.bf16.mxu1 %v5497_v1  ;;  %2778 = vmatprep.mubr.bf16.mxu0 %v5497_v1 }
 0x805   :  { %2708 = vmatpush1.bf16.msra.mxu1 %v5251_v62  ;;  %2749 = vmatpush1.bf16.msra.mxu0 %v5254_v43  ;;  %v5322_v62 = vld [vmem:[%s6602_s5 + $0x1cc] ss:$16 sps:$4 sm:$0xff]   ;;  %v5317_v43 = vld [vmem:[%s6602_s5 + $0x1c0] ss:$16 sps:$4 sm:$0xff]  }
 0x806   :  { %2846 = vmatprep.subr.bf16.mxu1 %v5259_v63  ;;  %2887 = vmatprep.subr.bf16.mxu0 %v5262_v3  ;;  %v5320_v63 = vld [vmem:[%s6602_s5 + $0x1c8] ss:$16 sps:$4 sm:$0xff]   ;;  %v3366_v3 = vpack.c.b16 %v5925_v52, %v5925_v52 }
 0x807   :  { %v5326_v52 = vld [vmem:[%s6602_s5 + $0x1e8] ss:$16 sps:$4 sm:$0xff]  }
 0x80c   :  { %4595 = vmatmul.mubr.msk.bf16.vlgmr.msra.gmra.mrb[48].mxu1 %vm297_vm11, %v2661_v9  ;;  %4596 = vmatmul.mubr.msk.bf16.vlgmr.msra.gmra.mrb[36].mxu0 %vm297_vm11, %v2661_v9  ;;  %v3505_v9 = vrot.slane %v5824_v13, 6  ;;  %v5337_v13 = vld [vmem:[%s6602_s5 + $0x3e4] ss:$16 sps:$4 sm:$0xff]  }
 0x80d   :  { %2847 = vmatpush1.bf16.msra.mxu1 %v5257_v7  ;;  %2888 = vmatpush1.bf16.msra.mxu0 %v5260_v8  ;;  %v5331_v7 = vld [vmem:[%s6602_s5 + $0x3c4] ss:$16 sps:$4 sm:$0xff]   ;;  %v5334_v8 = vld [vmem:[%s6602_s5 + $0x3cc] ss:$16 sps:$4 sm:$0xff]  }
 0x80e   :  { %2848 = vmatprep.subr.bf16.mxu1 %v5265_v10  ;;  %2889 = vmatprep.subr.bf16.mxu0 %v5268_v11  ;;  %v3504_v10 = vrot.slane %v5842_v48, 7  ;;  %v5340_v48 = vld [vmem:[%s6602_s5 + $0x3ec] ss:$16 sps:$4 sm:$0xff]  }
 0x80f   :  { %2878 = vmatprep.mubr.bf16.mxu1 %v5497_v1  ;;  %2919 = vmatprep.mubr.bf16.mxu0 %v5497_v1 }
 0x810   :  { %v3506_v11 = vsel %vm1528_vm15, %v3505_v9, %v3504_v10  ;;  %v5416_v9 = vld [vmem:[%s6604_s6 + $0x1c0] ss:$8 sps:$4 sm:$0xff]   ;;  %v5421_v10 = vld [vmem:[%s6604_s6 + $0xd4] ss:$8 sps:$4 sm:$0xff]  }
 0x811   :  { %2849 = vmatpush1.bf16.msra.mxu1 %v5263_v12  ;;  %2890 = vmatpush1.bf16.msra.mxu0 %v5266_v14  ;;  %v5329_v12 = vld [vmem:[%s6602_s5 + $0x3c0] ss:$16 sps:$4 sm:$0xff]   ;;  %v5332_v14 = vld [vmem:[%s6602_s5 + $0x3c8] ss:$16 sps:$4 sm:$0xff]  }
 0x812   :  { %2987 = vmatprep.subr.bf16.mxu1 %v5271_v15  ;;  %3028 = vmatprep.subr.bf16.mxu0 %v5274_v16  ;;  %v3507_v15 = vpack.c.b16 %v3506_v11, %v3506_v11  ;;  %v5335_v16 = vld [vmem:[%s6602_s5 + $0x3e0] ss:$16 sps:$4 sm:$0xff]   ;;  %v5424_v11 = vld [vmem:[%s6604_s6 + $0x1d4] ss:$8 sps:$4 sm:$0xff]  }
 0x818   :  { %4605 = vmatmul.mubr.msk.bf16.vlgmr.msra.gmra.mrb[48].mxu1 %vm297_vm11, %v2802_v18  ;;  %4606 = vmatmul.mubr.msk.bf16.vlgmr.msra.gmra.mrb[36].mxu0 %vm297_vm11, %v2802_v18  ;;  %v5346_v18 = vld [vmem:[%s6604_s6 + $0x104] ss:$8 sps:$4 sm:$0xff]  }
 0x819   :  { %2988 = vmatpush1.bf16.msra.mxu1 %v5269_v17  ;;  %3029 = vmatpush1.bf16.msra.mxu0 %v5272_v19  ;;  %v5338_v17 = vld [vmem:[%s6602_s5 + $0x3e8] ss:$16 sps:$4 sm:$0xff]   ;;  %v5343_v19 = vld [vmem:[%s6604_s6 + $0x4] ss:$8 sps:$4 sm:$0xff]  }
 0x81a   :  { %2989 = vmatprep.subr.bf16.mxu1 %v5277_v20  ;;  %3030 = vmatprep.subr.bf16.mxu0 %v5280_v21  ;;  %v5341_v20 = vld [vmem:[%s6604_s6] ss:$8 sps:$4 sm:$0xff]  }
 0x81b   :  { %3019 = vmatprep.mubr.bf16.mxu1 %v5497_v1  ;;  %3060 = vmatprep.mubr.bf16.mxu0 %v5497_v1  ;;  %v5344_v21 = vld [vmem:[%s6604_s6 + $0x100] ss:$8 sps:$4 sm:$0xff]  }
 0x81d   :  { %2990 = vmatpush1.bf16.msra.mxu1 %v5275_v22  ;;  %3031 = vmatpush1.bf16.msra.mxu0 %v5278_v50  ;;  %v3648_v22 = vpack.c.b16 %v5928_v53, %v5928_v53  ;;  %v5349_v50 = vld [vmem:[%s6604_s6 + $0x14] ss:$8 sps:$4 sm:$0xff]   ;;  %v5350_v53 = vld [vmem:[%s6604_s6 + $0x110] ss:$8 sps:$4 sm:$0xff]  }
 0x81e   :  { %3128 = vmatprep.subr.bf16.mxu1 %v5283_v25  ;;  %3169 = vmatprep.subr.bf16.mxu0 %v5286_v26  ;;  %v5347_v25 = vld [vmem:[%s6604_s6 + $0x10] ss:$8 sps:$4 sm:$0xff]   ;;  %v5355_v26 = vld [vmem:[%s6604_s6 + $0x24] ss:$8 sps:$4 sm:$0xff]  }
 0x824   :  { %4615 = vmatmul.mubr.msk.bf16.vlgmr.msra.gmra.mrb[48].mxu1 %vm297_vm11, %v2943_v30  ;;  %4616 = vmatmul.mubr.msk.bf16.vlgmr.msra.gmra.mrb[36].mxu0 %vm297_vm11, %v2943_v30  ;;  %v5359_v30 = vld [vmem:[%s6604_s6 + $0x30] ss:$8 sps:$4 sm:$0xff]  }
 0x825   :  { %3129 = vmatpush1.bf16.msra.mxu1 %v5281_v23  ;;  %3170 = vmatpush1.bf16.msra.mxu0 %v5284_v29  ;;  %v5361_v23 = vld [vmem:[%s6604_s6 + $0x34] ss:$8 sps:$4 sm:$0xff]  }
 0x826   :  { %3130 = vmatprep.subr.bf16.mxu1 %v5289_v31  ;;  %3171 = vmatprep.subr.bf16.mxu0 %v5292_v32  ;;  %v5364_v29 = vld [vmem:[%s6604_s6 + $0x134] ss:$8 sps:$4 sm:$0xff]   ;;  %v5362_v31 = vld [vmem:[%s6604_s6 + $0x130] ss:$8 sps:$4 sm:$0xff]   ;;  %v5367_v32 = vld [vmem:[%s6604_s6 + $0x44] ss:$8 sps:$4 sm:$0xff]  }
 0x827   :  { %3160 = vmatprep.mubr.bf16.mxu1 %v5497_v1  ;;  %3201 = vmatprep.mubr.bf16.mxu0 %v5497_v1 }
 0x829   :  { %3131 = vmatpush1.bf16.msra.mxu1 %v5287_v33  ;;  %3172 = vmatpush1.bf16.msra.mxu0 %v5290_v34  ;;  %v5370_v33 = vld [vmem:[%s6604_s6 + $0x144] ss:$8 sps:$4 sm:$0xff]   ;;  %v5365_v34 = vld [vmem:[%s6604_s6 + $0x40] ss:$8 sps:$4 sm:$0xff]  }
 0x82a   :  { %3269 = vmatprep.subr.bf16.mxu1 %v5295_v35  ;;  %3310 = vmatprep.subr.bf16.mxu0 %v5298_v36  ;;  %v5368_v35 = vld [vmem:[%s6604_s6 + $0x140] ss:$8 sps:$4 sm:$0xff]   ;;  %v5373_v36 = vld [vmem:[%s6604_s6 + $0x54] ss:$8 sps:$4 sm:$0xff]  }
 0x830   :  { %4625 = vmatmul.mubr.msk.bf16.vlgmr.msra.gmra.mrb[48].mxu1 %vm297_vm11, %v3084_v38  ;;  %4626 = vmatmul.mubr.msk.bf16.vlgmr.msra.gmra.mrb[36].mxu0 %vm297_vm11, %v3084_v38  ;;  %v5374_v38 = vld [vmem:[%s6604_s6 + $0x150] ss:$8 sps:$4 sm:$0xff]  }
 0x831   :  { %3270 = vmatpush1.bf16.msra.mxu1 %v5293_v27  ;;  %3311 = vmatpush1.bf16.msra.mxu0 %v5296_v37  ;;  %v5376_v27 = vld [vmem:[%s6604_s6 + $0x154] ss:$8 sps:$4 sm:$0xff]   ;;  %v5371_v37 = vld [vmem:[%s6604_s6 + $0x50] ss:$8 sps:$4 sm:$0xff]  }
 0x832   :  { %3271 = vmatprep.subr.bf16.mxu1 %v5301_v39  ;;  %3312 = vmatprep.subr.bf16.mxu0 %v5304_v40  ;;  %v5379_v39 = vld [vmem:[%s6604_s6 + $0x64] ss:$8 sps:$4 sm:$0xff]  }
 0x833   :  { %3301 = vmatprep.mubr.bf16.mxu1 %v5497_v1  ;;  %3342 = vmatprep.mubr.bf16.mxu0 %v5497_v1  ;;  %v5382_v40 = vld [vmem:[%s6604_s6 + $0x164] ss:$8 sps:$4 sm:$0xff]  }
 0x835   :  { %3272 = vmatpush1.bf16.msra.mxu1 %v5299_v41  ;;  %3313 = vmatpush1.bf16.msra.mxu0 %v5302_v51  ;;  %v5377_v41 = vld [vmem:[%s6604_s6 + $0x60] ss:$8 sps:$4 sm:$0xff]  }
 0x836   :  { %3410 = vmatprep.subr.bf16.mxu1 %v5307_v42  ;;  %3451 = vmatprep.subr.bf16.mxu0 %v5310_v44  ;;  %v5380_v51 = vld [vmem:[%s6604_s6 + $0x160] ss:$8 sps:$4 sm:$0xff]   ;;  %v5385_v42 = vld [vmem:[%s6604_s6 + $0x74] ss:$8 sps:$4 sm:$0xff]  }
 0x837   :  { %v5388_v44 = vld [vmem:[%s6604_s6 + $0x174] ss:$8 sps:$4 sm:$0xff]  }
 0x83c   :  { %4635 = vmatmul.mubr.msk.bf16.vlgmr.msra.gmra.mrb[48].mxu1 %vm297_vm11, %v3225_v56  ;;  %4636 = vmatmul.mubr.msk.bf16.vlgmr.msra.gmra.mrb[36].mxu0 %vm297_vm11, %v3225_v56  ;;  %v5392_v56 = vld [vmem:[%s6604_s6 + $0x180] ss:$8 sps:$4 sm:$0xff]  }
 0x83d   :  { %3411 = vmatpush1.bf16.msra.mxu1 %v5305_v54  ;;  %3452 = vmatpush1.bf16.msra.mxu0 %v5308_v55  ;;  %v5394_v54 = vld [vmem:[%s6604_s6 + $0x184] ss:$8 sps:$4 sm:$0xff]   ;;  %v5389_v55 = vld [vmem:[%s6604_s6 + $0x80] ss:$8 sps:$4 sm:$0xff]  }
 0x83e   :  { %3412 = vmatprep.subr.bf16.mxu1 %v5313_v57  ;;  %3453 = vmatprep.subr.bf16.mxu0 %v5316_v59  ;;  %v5397_v57 = vld [vmem:[%s6604_s6 + $0x94] ss:$8 sps:$4 sm:$0xff]  }
 0x83f   :  { %3442 = vmatprep.mubr.bf16.mxu1 %v5497_v1  ;;  %3483 = vmatprep.mubr.bf16.mxu0 %v5497_v1  ;;  %v5400_v59 = vld [vmem:[%s6604_s6 + $0x194] ss:$8 sps:$4 sm:$0xff]  }
 0x841   :  { %3413 = vmatpush1.bf16.msra.mxu1 %v5311_v60  ;;  %3454 = vmatpush1.bf16.msra.mxu0 %v5314_v61  ;;  %v5395_v60 = vld [vmem:[%s6604_s6 + $0x90] ss:$8 sps:$4 sm:$0xff]  }
 0x842   :  { %3551 = vmatprep.subr.bf16.mxu1 %v5319_v0  ;;  %3592 = vmatprep.subr.bf16.mxu0 %v5322_v62  ;;  %v5398_v61 = vld [vmem:[%s6604_s6 + $0x190] ss:$8 sps:$4 sm:$0xff]   ;;  %v5403_v0 = vld [vmem:[%s6604_s6 + $0xa4] ss:$8 sps:$4 sm:$0xff]  }
 0x843   :  { %v5406_v62 = vld [vmem:[%s6604_s6 + $0x1a4] ss:$8 sps:$4 sm:$0xff]  }
 0x848   :  { %4645 = vmatmul.mubr.msk.bf16.vlgmr.msra.gmra.mrb[48].mxu1 %vm297_vm11, %v3366_v3  ;;  %4646 = vmatmul.mubr.msk.bf16.vlgmr.msra.gmra.mrb[36].mxu0 %vm297_vm11, %v3366_v3  ;;  %v5409_v3 = vld [vmem:[%s6604_s6 + $0xb4] ss:$8 sps:$4 sm:$0xff]  }
 0x849   :  { %3552 = vmatpush1.bf16.msra.mxu1 %v5317_v43  ;;  %3593 = vmatpush1.bf16.msra.mxu0 %v5320_v63  ;;  %v5401_v43 = vld [vmem:[%s6604_s6 + $0xa0] ss:$8 sps:$4 sm:$0xff]  }
 0x84a   :  { %3553 = vmatprep.subr.bf16.mxu1 %v5325_v4  ;;  %3594 = vmatprep.subr.bf16.mxu0 %v5328_v5  ;;  %v5404_v63 = vld [vmem:[%s6604_s6 + $0x1a0] ss:$8 sps:$4 sm:$0xff]   ;;  %v5412_v4 = vld [vmem:[%s6604_s6 + $0x1b4] ss:$8 sps:$4 sm:$0xff]   ;;  %v5407_v5 = vld [vmem:[%s6604_s6 + $0xb0] ss:$8 sps:$4 sm:$0xff]  }
 0x84b   :  { %3583 = vmatprep.mubr.bf16.mxu1 %v5497_v1  ;;  %3624 = vmatprep.mubr.bf16.mxu0 %v5497_v1 }
 0x84d   :  { %3554 = vmatpush1.bf16.msra.mxu1 %v5323_v6  ;;  %3595 = vmatpush1.bf16.msra.mxu0 %v5326_v52  ;;  %v5410_v6 = vld [vmem:[%s6604_s6 + $0x1b0] ss:$8 sps:$4 sm:$0xff]   ;;  %v5415_v52 = vld [vmem:[%s6604_s6 + $0xc4] ss:$8 sps:$4 sm:$0xff]  }
 0x84e   :  { %3692 = vmatprep.subr.bf16.mxu1 %v5331_v7  ;;  %3733 = vmatprep.subr.bf16.mxu0 %v5334_v8  ;;  %v5418_v7 = vld [vmem:[%s6604_s6 + $0x1c4] ss:$8 sps:$4 sm:$0xff]   ;;  %v5413_v8 = vld [vmem:[%s6604_s6 + $0xc0] ss:$8 sps:$4 sm:$0xff]  }
 0x854   :  { %4655 = vmatmul.mubr.msk.bf16.vlgmr.msra.gmra.mrb[48].mxu1 %vm297_vm11, %v3507_v15  ;;  %4656 = vmatmul.mubr.msk.bf16.vlgmr.msra.gmra.mrb[36].mxu0 %vm297_vm11, %v3507_v15  ;;  %v5427_v15 = vld [vmem:[%s6604_s6 + $0xe4] ss:$8 sps:$4 sm:$0xff]  }
 0x855   :  { %3693 = vmatpush1.bf16.msra.mxu1 %v5329_v12  ;;  %3734 = vmatpush1.bf16.msra.mxu0 %v5332_v14  ;;  %v5419_v12 = vld [vmem:[%s6604_s6 + $0xd0] ss:$8 sps:$4 sm:$0xff]  }
 0x856   :  { %3694 = vmatprep.subr.bf16.mxu1 %v5337_v13  ;;  %3735 = vmatprep.subr.bf16.mxu0 %v5340_v48  ;;  %v5422_v14 = vld [vmem:[%s6604_s6 + $0x1d0] ss:$8 sps:$4 sm:$0xff]   ;;  %v5430_v13 = vld [vmem:[%s6604_s6 + $0x1e4] ss:$8 sps:$4 sm:$0xff]   ;;  %v5425_v48 = vld [vmem:[%s6604_s6 + $0xe0] ss:$8 sps:$4 sm:$0xff]  }
 0x857   :  { %3724 = vmatprep.mubr.bf16.mxu1 %v5497_v1  ;;  %3765 = vmatprep.mubr.bf16.mxu0 %v5497_v1  ;;  %v5352_v1 = vld [vmem:[%s6604_s6 + $0x114] ss:$8 sps:$4 sm:$0xff]  }
 0x859   :  { %3695 = vmatpush1.bf16.msra.mxu1 %v5335_v16  ;;  %3736 = vmatpush1.bf16.msra.mxu0 %v5338_v17  ;;  %v5428_v16 = vld [vmem:[%s6604_s6 + $0x1e0] ss:$8 sps:$4 sm:$0xff]   ;;  %v5433_v17 = vld [vmem:[%s6604_s6 + $0xf4] ss:$8 sps:$4 sm:$0xff]  }
 0x85a   :  { %4189 = vmatprep.subr.bf16.mxu0 %v5343_v19  ;;  %4230 = vmatprep.subr.bf16.mxu1 %v5346_v18  ;;  %v5431_v19 = vld [vmem:[%s6604_s6 + $0xf0] ss:$8 sps:$4 sm:$0xff]  }
 0x85b   :  { %v5434_v18 = vld [vmem:[%s6604_s6 + $0x1f0] ss:$8 sps:$4 sm:$0xff]  }
 0x860   :  { %4665 = vmatmul.mubr.msk.bf16.vlgmr.msra.gmra.mrb[48].mxu1 %vm297_vm11, %v3648_v22  ;;  %4666 = vmatmul.mubr.msk.bf16.vlgmr.msra.gmra.mrb[36].mxu0 %vm297_vm11, %v3648_v22  ;;  %v1382_v22 = vld [vmem:[%s6602_s5 + $0x400] sm:$0x88] }
 0x861   :  { %4190 = vmatpush1.bf16.msra.mxu0 %v5341_v20  ;;  %4231 = vmatpush1.bf16.msra.mxu1 %v5344_v21  ;;  %v5436_v20 = vld [vmem:[%s6604_s6 + $0x1f4] ss:$8 sps:$4 sm:$0xff]   ;;  %v5437_v21 = vld [vmem:[%s6605_s7 + $0x40] sm:$0xff]  }
 0x862   :  { %4191 = vmatprep.subr.bf16.mxu0 %v5349_v50  ;;  %4232 = vmatprep.subr.bf16.mxu1 %v5352_v1  ;;  %v1383_v50 = vld [vmem:[%s6602_s5 + $0x408] sm:$0x88]  ;;  %v1384_v1 = vunpack.c.l.bf16 %v1382_v22 }
 0x865   :  { %4192 = vmatpush1.bf16.msra.mxu0 %v5347_v25  ;;  %4233 = vmatpush1.bf16.msra.mxu1 %v5350_v53  ;;  %v1390_v25 = vsub.s32 6, %v5634_v58  ;;  %v1386_v53 = vunpack.c.l.bf16 %v1383_v50 }
 0x866   :  { %4193 = vmatprep.subr.bf16.mxu0 %v5355_v26  ;;  %4234 = vmatprep.subr.bf16.mxu1 %v5358_v24  ;;  %v1385_v26 = vunpack.c.h.bf16 %v1382_v22  ;;  %v1387_v24 = vunpack.c.h.bf16 %v1383_v50 }
 0x869   :  { %4194 = vmatpush1.bf16.msra.mxu0 %v5353_v28  ;;  %4235 = vmatpush1.bf16.msra.mxu1 %v5356_v47  ;;  %v1391_v28 = vrot.slane %v1384_v1, %v1390_v25  ;;  %v1399_v47 = vrot.slane %v1386_v53, %v1390_v25 }
 0x86a   :  { %4195 = vmatprep.subr.bf16.mxu0 %v5361_v23  ;;  %4236 = vmatprep.subr.bf16.mxu1 %v5364_v29  ;;  %v1395_v23 = vrot.slane %v1385_v26, %v1390_v25  ;;  %v1403_v29 = vrot.slane %v1387_v24, %v1390_v25 }
 0x86d   :  { %4196 = vmatpush1.bf16.msra.mxu0 %v5359_v30  ;;  %4237 = vmatpush1.bf16.msra.mxu1 %v5362_v31 }
 0x86e   :  { %4197 = vmatprep.subr.bf16.mxu0 %v5367_v32  ;;  %4238 = vmatprep.subr.bf16.mxu1 %v5370_v33 }
 0x871   :  { %4198 = vmatpush1.bf16.msra.mxu0 %v5365_v34  ;;  %4239 = vmatpush1.bf16.msra.mxu1 %v5368_v35 }
 0x872   :  { %4199 = vmatprep.subr.bf16.mxu0 %v5373_v36  ;;  %4240 = vmatprep.subr.bf16.mxu1 %v5376_v27 }
 0x875   :  { %4200 = vmatpush1.bf16.msra.mxu0 %v5371_v37  ;;  %4241 = vmatpush1.bf16.msra.mxu1 %v5374_v38 }
 0x876   :  { %4201 = vmatprep.subr.bf16.mxu0 %v5379_v39  ;;  %4242 = vmatprep.subr.bf16.mxu1 %v5382_v40 }
 0x879   :  { %4202 = vmatpush1.bf16.msra.mxu0 %v5377_v41  ;;  %4243 = vmatpush1.bf16.msra.mxu1 %v5380_v51 }
 0x87a   :  { %4203 = vmatprep.subr.bf16.mxu0 %v5385_v42  ;;  %4244 = vmatprep.subr.bf16.mxu1 %v5388_v44 }
 0x87d   :  { %4204 = vmatpush1.bf16.msra.mxu0 %v5383_v45  ;;  %4245 = vmatpush1.bf16.msra.mxu1 %v5386_v46 }
 0x87e   :  { %4205 = vmatprep.subr.bf16.mxu0 %v5391_v49  ;;  %4246 = vmatprep.subr.bf16.mxu1 %v5394_v54 }
 0x881   :  { %4206 = vmatpush1.bf16.msra.mxu0 %v5389_v55  ;;  %4247 = vmatpush1.bf16.msra.mxu1 %v5392_v56  ;;  %v5438_v56 = vld [vmem:[%s6605_s7] sm:$0xff]  }
 0x882   :  { %4207 = vmatprep.subr.bf16.mxu0 %v5397_v57  ;;  %4248 = vmatprep.subr.bf16.mxu1 %v5400_v59 }
 0x885   :  { %4208 = vmatpush1.bf16.msra.mxu0 %v5395_v60  ;;  %4249 = vmatpush1.bf16.msra.mxu1 %v5398_v61  ;;  %v5439_v60 = vld [vmem:[%s6605_s7 + $0x48] sm:$0xff]  }
 0x886   :  { %4209 = vmatprep.subr.bf16.mxu0 %v5403_v0  ;;  %4250 = vmatprep.subr.bf16.mxu1 %v5406_v62  ;;  %v5440_v61 = vld [vmem:[%s6605_s7 + $0x8] sm:$0xff]   ;;  %v5441_v0 = vld [vmem:[%s6605_s7 + $0x50] sm:$0xff]  }
 0x887   :  { %v5442_v62 = vld [vmem:[%s6605_s7 + $0x10] sm:$0xff]  }
 0x889   :  { %4210 = vmatpush1.bf16.msra.mxu0 %v5401_v43  ;;  %4251 = vmatpush1.bf16.msra.mxu1 %v5404_v63  ;;  %v5443_v43 = vld [vmem:[%s6605_s7 + $0x58] sm:$0xff]  }
 0x88a   :  { %4211 = vmatprep.subr.bf16.mxu0 %v5409_v3  ;;  %4252 = vmatprep.subr.bf16.mxu1 %v5412_v4  ;;  %v5444_v63 = vld [vmem:[%s6605_s7 + $0x18] sm:$0xff]   ;;  %v5445_v3 = vld [vmem:[%s6605_s7 + $0x60] sm:$0xff]  }
 0x88b   :  { %v5446_v4 = vld [vmem:[%s6605_s7 + $0x20] sm:$0xff]  }
 0x88d   :  { %4212 = vmatpush1.bf16.msra.mxu0 %v5407_v5  ;;  %4253 = vmatpush1.bf16.msra.mxu1 %v5410_v6  ;;  %v5447_v5 = vld [vmem:[%s6605_s7 + $0x68] sm:$0xff]  }
 0x88e   :  { %4213 = vmatprep.subr.bf16.mxu0 %v5415_v52  ;;  %4254 = vmatprep.subr.bf16.mxu1 %v5418_v7  ;;  %v5448_v6 = vld [vmem:[%s6605_s7 + $0x28] sm:$0xff]   ;;  %v5449_v52 = vld [vmem:[%s6605_s7 + $0x70] sm:$0xff]  }
 0x88f   :  { %v5450_v7 = vld [vmem:[%s6605_s7 + $0x30] sm:$0xff]  }
 0x891   :  { %4214 = vmatpush1.bf16.msra.mxu0 %v5413_v8  ;;  %4255 = vmatpush1.bf16.msra.mxu1 %v5416_v9  ;;  %v5451_v8 = vld [vmem:[%s6605_s7 + $0x78] sm:$0xff]  }
 0x892   :  { %4215 = vmatprep.subr.bf16.mxu0 %v5421_v10  ;;  %4256 = vmatprep.subr.bf16.mxu1 %v5424_v11  ;;  %v5452_v9 = vld [vmem:[%s6605_s7 + $0x38] sm:$0xff]   ;;  %v3858_v10 = vld [vmem:[%s6604_s6 + $0x200] sm:$0x11] }
 0x893   :  { %v3859_v11 = vunpack.c.l.bf16 %v3858_v10 }
 0x895   :  { %4216 = vmatpush1.bf16.msra.mxu0 %v5419_v12  ;;  %4257 = vmatpush1.bf16.msra.mxu1 %v5422_v14  ;;  %v3860_v12 = vunpack.c.h.bf16 %v3858_v10  ;;  %v3864_v14 = vrot.slane %v3859_v11, %v5643_v2 }
 0x896   :  { %4217 = vmatprep.subr.bf16.mxu0 %v5427_v15  ;;  %4258 = vmatprep.subr.bf16.mxu1 %v5430_v13 }
 0x897   :  { %v3868_v15 = vrot.slane %v3860_v12, %v5643_v2 }
 0x899   :  { %4218 = vmatpush1.bf16.msra.mxu0 %v5425_v48  ;;  %4259 = vmatpush1.bf16.msra.mxu1 %v5428_v16 }
 0x89a   :  { %4219 = vmatprep.subr.bf16.mxu0 %v5433_v17  ;;  %4260 = vmatprep.subr.bf16.mxu1 %v5436_v20 }
 0x89d   :  { %4220 = vmatpush1.bf16.msra.mxu0 %v5431_v19  ;;  %4261 = vmatpush1.bf16.msra.mxu1 %v5434_v18 }
 0x89e   :  { %4800 = vmatprep.subr.bf16.mxu0 %v5437_v21 }
 0x933   :  { %v3726_v30 = vpop.f32.mrb[48].mxu1  ;;  %v3767_v31 = vpop.f32.mrb[36].mxu0 }
 0x934   :  { %v4966_v32 = vadd.f32 %v3726_v30, %v1391_v28  ;;  %v4968_v33 = vadd.f32 %v3767_v31, %v1399_v47  ;;  %v3728_v34 = vpop.f32.mrb[49].mxu1  ;;  %v3769_v35 = vpop.f32.mrb[37].mxu0 }
 0x935   :  { %v4967_v36 = vadd.f32 %v3728_v34, %v1395_v23  ;;  %v4969_v27 = vadd.f32 %v3769_v35, %v1403_v29  ;;  %v3730_v37 = vpop.f32.mrb[50].mxu1  ;;  %v3771_v38 = vpop.f32.mrb[38].mxu0  ;;  %v4311_v29 = vld [vmem:[%s6605_s7 + $0x80] sm:$0x1] }
 0x936   :  { %vm3778_vm1 = vcmp.gt.f32.partialorder %v4966_v32, 0.0  ;;  %v3782_v39 = vmul.f32 0.01, %v4966_v32  ;;  %vm3780_vm2 = vcmp.gt.f32.partialorder %v4968_v33, 0.0  ;;  %v3784_v58 = vmul.f32 0.01, %v4968_v33 }
 0x937   :  { %vm3779_vm3 = vcmp.gt.f32.partialorder %v4967_v36, 0.0  ;;  %v3783_v40 = vmul.f32 0.01, %v4967_v36  ;;  %vm3781_vm4 = vcmp.gt.f32.partialorder %v4969_v27, 0.0  ;;  %v3785_v41 = vmul.f32 0.01, %v4969_v27 }
 0x938   :  { %v3786_v51 = vsel %vm3778_vm1, %v4966_v32, %v3782_v39  ;;  %v3788_v42 = vsel %vm3780_vm2, %v4968_v33, %v3784_v58  ;;  %v3731_v44 = vpop.f32.mrb[51].mxu1  ;;  %v3772_v45 = vpop.f32.mrb[39].mxu0  ;;  %v4312_v30 = vunpack.c.l.bf16 %v4311_v29 }
 0x939   :  { %v3787_v46 = vsel %vm3779_vm3, %v4967_v36, %v3783_v40  ;;  %v3789_v49 = vsel %vm3781_vm4, %v4969_v27, %v3785_v41  ;;  %v3790_v57 = vpack.c.bf16 %v3786_v51, %v3786_v51  ;;  %v3792_v59 = vpack.c.bf16 %v3788_v42, %v3788_v42 }
 0x93a   :  { %v3791_v54 = vpack.c.bf16 %v3787_v46, %v3787_v46  ;;  %v3793_v55 = vpack.c.bf16 %v3789_v49, %v3789_v49  ;;  %v4316_v32 = vrot.slane %v4312_v30, %v5643_v2 }
 0x93c   :  { %4221 = vmatprep.mubr.bf16.mxu0 %v3791_v54  ;;  %4262 = vmatprep.mubr.bf16.mxu1 %v3793_v55 }
 0x93d   :  { %4222 = vmatmul.mubr.bf16.vlgmr.msra.gmra.mrb[40].mxu0 %v3790_v57  ;;  %4263 = vmatmul.mubr.bf16.vlgmr.msra.gmra.mrb[52].mxu1 %v3792_v59 }
 0x93e   :  { %4801 = vmatpush3.bf16.msra.mxu0 %v5438_v56 }
 0x93f   :  { %4802 = vmatprep.subr.bf16.mxu0 %v5439_v60 }
 0x942   :  { %4803 = vmatpush3.bf16.msra.mxu0 %v5440_v61 }
 0x943   :  { %4804 = vmatprep.subr.bf16.mxu0 %v5441_v0 }
 0x946   :  { %4805 = vmatpush3.bf16.msra.mxu0 %v5442_v62 }
 0x947   :  { %4806 = vmatprep.subr.bf16.mxu0 %v5443_v43 }
 0x94a   :  { %4807 = vmatpush3.bf16.msra.mxu0 %v5444_v63 }
 0x94b   :  { %4808 = vmatprep.subr.bf16.mxu0 %v5445_v3 }
 0x94e   :  { %4809 = vmatpush3.bf16.msra.mxu0 %v5446_v4 }
 0x94f   :  { %4810 = vmatprep.subr.bf16.mxu0 %v5447_v5 }
 0x952   :  { %4811 = vmatpush3.bf16.msra.mxu0 %v5448_v6 }
 0x953   :  { %4812 = vmatprep.subr.bf16.mxu0 %v5449_v52 }
 0x956   :  { %4813 = vmatpush3.bf16.msra.mxu0 %v5450_v7 }
 0x957   :  { %4814 = vmatprep.subr.bf16.mxu0 %v5451_v8 }
 0x95a   :  { %4815 = vmatpush3.bf16.msra.mxu0 %v5452_v9 }
 0xa10   :  { %v4223_v13 = vpop.f32.mrb[40].mxu0  ;;  %v4264_v48 = vpop.f32.mrb[52].mxu1 }
 0xa11   :  { %v4224_v16 = vadd.f32 %v4223_v13, %v3864_v14  ;;  %v4225_v17 = vpop.f32.mrb[41].mxu0  ;;  %v4266_v19 = vpop.f32.mrb[53].mxu1 }
 0xa12   :  { %v4226_v18 = vadd.f32 %v4225_v17, %v3868_v15  ;;  %v4227_v20 = vpop.f32.mrb[42].mxu0  ;;  %v4268_v21 = vpop.f32.mrb[54].mxu1 }
 0xa13   :  { %v4265_v22 = vadd.f32 %v4264_v48, %v4224_v16  ;;  %v4228_v50 = vpop.f32.mrb[43].mxu0  ;;  %v4269_v1 = vpop.f32.mrb[55].mxu1 }
 0xa14   :  { %v4267_v25 = vadd.f32 %v4266_v19, %v4226_v18 }
 0xa15   :  { %vm4271_vm5 = vcmp.gt.f32.partialorder %v4265_v22, 0.0  ;;  %v4273_v53 = vmul.f32 0.01, %v4265_v22 }
 0xa16   :  { %vm4272_vm6 = vcmp.gt.f32.partialorder %v4267_v25, 0.0  ;;  %v4274_v26 = vmul.f32 0.01, %v4267_v25 }
 0xa17   :  { %v4275_v24 = vsel %vm4271_vm5, %v4265_v22, %v4273_v53 }
 0xa18   :  { %v4276_v28 = vsel %vm4272_vm6, %v4267_v25, %v4274_v26  ;;  %v4277_v23 = vpack.c.bf16 %v4275_v24, %v4275_v24 }
 0xa19   :  { %v4278_v47 = vpack.c.bf16 %v4276_v28, %v4276_v28 }
 0xa1b   :  { %4445 = vmatprep.mubr.bf16.mxu0 %v4278_v47 }
 0xa1c   :  { %4446 = vmatmul.mubr.bf16.vlgmr.msra.gmra.mrb[44].mxu0 %v4277_v23 }
 0xaef   :  { %v4816_v31 = vpop.f32.mrb[44].mxu0 }
 0xaf0   :  { %v4817_v33 = vpop.f32.mrb[45].mxu0 }
 0xaf1   :  { %v4818_v34 = vadd.f32 %v4817_v33, %v4816_v31  ;;  %v4819_v35 = vpop.f32.mrb[46].mxu0 }
 0xaf2   :  { %v4820_v36 = vpop.f32.mrb[47].mxu0 }
 0xaf3   :  { %v4448_v27 = vadd.f32 %v4818_v34, %v4316_v32 }
 0xaf5   :  { %v4453_v37 = vmax.f32 %v4448_v27, 0.0 }
 0xaf7   :  { %4454 = vst [vmem:[%s6606_s8] sm:$0x3] %v4453_v37 }

</bundles_post_ra>
